<compile_context>
chip_gen: v6e
topology: v6e:2x2x1
jax: 0.10.0
libtpu: 0.0.40
codegen_flags: <defaults>
</compile_context>

<pallas_src>
from functools import partial

import jax
import jax.numpy as jnp
import numpy as np
from jax.experimental import pallas as pl
from jax.experimental.pallas import tpu as pltpu

_SUBLANE = 8  # f32 sublane tile
_VMEM_SPEC = pl.BlockSpec(memory_space=pltpu.MemorySpace.VMEM)


# ----------------------------- Pallas kernel -------------------------------

def _fused_lstm_fc_kernel(T, H, num_layers, unroll, mm_dtype, *refs):
    """Fused num_layers-deep LSTM over the whole sequence + final FC.

    refs layout:
      inputs : x_ref (T*B, Din0)  -- time-major, batch-padded, pre-flattened
               [wih_l (Din_l, 4H), whh_l (H, 4H), b_l (1, 4H)] * num_layers
               fcw_ref (H, O), fcb_ref (1, O)
      outputs: out_ref (B, O)
      scratch: gates_ref (T*B, 4H) -- hoisted layer-0 x @ W_ih + b (VMEM)
    Packed gate column order is (i, f, o, g).
    """
    x_ref = refs[0]
    layer_refs = refs[1:1 + 3 * num_layers]
    fcw_ref = refs[1 + 3 * num_layers]
    fcb_ref = refs[2 + 3 * num_layers]
    out_ref = refs[3 + 3 * num_layers]
    gates_ref = refs[4 + 3 * num_layers]

    B = out_ref.shape[0]
    G = 4 * H

    def mm(a, w):
        # MXU matmul; operands optionally bf16, accumulation always f32.
        return jnp.dot(a.astype(mm_dtype), w, preferred_element_type=jnp.float32)

    # Hoist all weight loads / casts out of the recurrence (small: fit in vregs).
    wih = [layer_refs[3 * l][...].astype(mm_dtype) for l in range(num_layers)]
    whh = [layer_refs[3 * l + 1][...].astype(mm_dtype) for l in range(num_layers)]
    bias0 = layer_refs[2][...]                                    # (1, 4H), f32
    # Hoisted bias broadcasts for layers >= 1 (broadcast_in_dim is not CSE'd).
    bias_b = [None] + [jnp.broadcast_to(layer_refs[3 * l + 2][...], (B, G))
                       for l in range(1, num_layers)]

    # Hoisted layer-0 input projection: ALL timesteps in one MXU matmul,
    # written straight to a flat (T*B, 4H) scratch -- no in-kernel reshape.
    gates_ref[...] = mm(x_ref[...], wih[0]) + bias0

    def sigmoid_via_tanh(v):
        # EUP has native tanh but no sigmoid: 1 EUP push + cheap VPU mul/add.
        return 0.5 * jnp.tanh(0.5 * v) + 0.5

    def step(t, carry):
        hs, cs = carry
        row = pl.multiple_of(t * B, _SUBLANE)
        new_hs, new_cs = [], []
        prev_h = None
        for l in range(num_layers):
            if l == 0:
                pre = gates_ref[pl.ds(row, B), :]
            else:
                # Wavefront: layer l consumes layer l-1's h_t of THIS step...
                pre = mm(prev_h, wih[l]) + bias_b[l]
            # ...but every layer's W_hh matmul only depends on the previous
            # super-step, so these issue back-to-back across layers.
            gates = pre + mm(hs[l], whh[l])
            ifo = sigmoid_via_tanh(gates[:, :3 * H])   # i, f, o: one EUP pass
            g = jnp.tanh(gates[:, 3 * H:])             # g: one EUP pass
            i = ifo[:, :H]
            f = ifo[:, H:2 * H]
            o = ifo[:, 2 * H:]
            c = f * cs[l] + i * g                      # f32 state (v5e-safe)
            h = o * jnp.tanh(c)
            new_hs.append(h)
            new_cs.append(c)
            prev_h = h
        return (tuple(new_hs), tuple(new_cs))

    zeros = jnp.zeros((B, H), jnp.float32)
    init = (tuple(zeros for _ in range(num_layers)),
            tuple(zeros for _ in range(num_layers)))
    hs, _ = jax.lax.fori_loop(0, T, step, init, unroll=unroll)

    # Final Linear on the last layer's last hidden state; only HBM write.
    out_ref[...] = (mm(hs[-1], fcw_ref[...].astype(mm_dtype))
                    + fcb_ref[...]).astype(out_ref.dtype)


# ------------------------------- wrapper ------------------------------------

def lstm_model_forward(x, params, *, matmul_dtype=jnp.float32, unroll=8):
    """Equivalent of LSTM.forward: multi-layer LSTM (zero h0/c0) -> fc(last)."""
    B, T, Din = x.shape
    num_layers = len(params["layers"])
    H = params["layers"][0][1].shape[0]
    O = params["fc"][0].shape[1]

    # Pad batch to the f32 sublane tile, go time-major, and pre-flatten to
    # (T*B, Din) so the kernel's hoisted projection is a plain 2-D matmul.
    B_pad = max(_SUBLANE, ((B + _SUBLANE - 1) // _SUBLANE) * _SUBLANE)
    x_tm = jnp.transpose(x, (1, 0, 2))
    if B_pad != B:
        x_tm = jnp.pad(x_tm, ((0, 0), (0, B_pad - B), (0, 0)))
    x_flat = x_tm.reshape(T * B_pad, Din)

    flat_w = []
    for (wih_t, whh_t, b) in params["layers"]:
        flat_w += [wih_t, whh_t, b]
    fc_w_t, fc_b = params["fc"]
    inputs = (x_flat, *flat_w, fc_w_t, fc_b)

    # Size VMEM from the actual buffers (headroom for compiler scratch),
    # capped at 48 MiB so it also fits v7x's 64 MiB per-TC VMEM.
    io_bytes = sum(int(np.prod(a.shape)) * a.dtype.itemsize for a in inputs)
    io_bytes += B_pad * O * 4
    scratch_bytes = T * B_pad * 4 * H * 4
    vmem_limit = int(min(max(2 * (io_bytes + scratch_bytes) + (8 << 20),
                             16 << 20), 48 << 20))

    out = pl.pallas_call(
        partial(_fused_lstm_fc_kernel, T, H, num_layers,
                max(1, min(unroll, T)), jnp.dtype(matmul_dtype)),
        out_shape=jax.ShapeDtypeStruct((B_pad, O), jnp.float32),
        in_specs=[_VMEM_SPEC] * len(inputs),
        out_specs=_VMEM_SPEC,
        scratch_shapes=[
            pltpu.VMEM((T * B_pad, 4 * H), jnp.float32),  # hoisted layer-0 gates
        ],
        compiler_params=pltpu.CompilerParams(vmem_limit_bytes=vmem_limit),
    )(*inputs)
    return out[:B]


# ------------------------- params & pure-JAX reference ----------------------

def _reorder_gates_ifog(w, H):
    """PyTorch packs gates as (i, f, g, o) along axis 0; repack to (i, f, o, g)."""
    return jnp.concatenate([w[:2 * H], w[3 * H:4 * H], w[2 * H:3 * H]], axis=0)


def init_params(key, input_dim, hidden_dim, num_layers, output_dim):
    k = 1.0 / np.sqrt(hidden_dim)  # PyTorch-style uniform(-1/sqrt(H), 1/sqrt(H))
    raw_layers, packed_layers = [], []
    for layer in range(num_layers):
        din = input_dim if layer == 0 else hidden_dim
        key, k1, k2, k3, k4 = jax.random.split(key, 5)
        w_ih = jax.random.uniform(k1, (4 * hidden_dim, din), jnp.float32, -k, k)
        w_hh = jax.random.uniform(k2, (4 * hidden_dim, hidden_dim), jnp.float32, -k, k)
        b_ih = jax.random.uniform(k3, (4 * hidden_dim,), jnp.float32, -k, k)
        b_hh = jax.random.uniform(k4, (4 * hidden_dim,), jnp.float32, -k, k)
        raw_layers.append((w_ih, w_hh, b_ih, b_hh))
        packed_layers.append((
            _reorder_gates_ifog(w_ih, hidden_dim).T,                 # (Din, 4H)
            _reorder_gates_ifog(w_hh, hidden_dim).T,                 # (H, 4H)
            _reorder_gates_ifog(b_ih + b_hh, hidden_dim)[None, :],   # (1, 4H)
        ))
    key, k5, k6 = jax.random.split(key, 3)
    fc_w = jax.random.uniform(k5, (output_dim, hidden_dim), jnp.float32, -k, k)
    fc_b = jax.random.uniform(k6, (output_dim,), jnp.float32, -k, k)
    return {
        "layers": packed_layers,
        "fc": (fc_w.T, fc_b[None, :]),
        "raw_layers": raw_layers,   # canonical PyTorch layout, for the reference
        "raw_fc": (fc_w, fc_b),
    }


def lstm_model_reference(x, params):
    """Pure-JAX reference in the canonical PyTorch (i, f, g, o) gate order."""
    B = x.shape[0]
    h_seq = x
    for (w_ih, w_hh, b_ih, b_hh) in params["raw_layers"]:
        H = w_hh.shape[1]
        h = jnp.zeros((B, H), jnp.float32)
        c = jnp.zeros((B, H), jnp.float32)
        outs = []
        for t in range(h_seq.shape[1]):
            gates = h_seq[:, t, :] @ w_ih.T + h @ w_hh.T + b_ih + b_hh
            i = jax.nn.sigmoid(gates[:, :H])
            f = jax.nn.sigmoid(gates[:, H:2 * H])
            g = jnp.tanh(gates[:, 2 * H:3 * H])
            o = jax.nn.sigmoid(gates[:, 3 * H:4 * H])
            c = f * c + i * g
            h = o * jnp.tanh(c)
            outs.append(h)
        h_seq = jnp.stack(outs, axis=1)
    fc_w, fc_b = params["raw_fc"]
    return h_seq[:, -1, :] @ fc_w.T + fc_b


# ---------------------------------- main ------------------------------------

if __name__ == "__main__":
    batch, seq = 2, 8
    input_dim, hidden_dim, num_layers, output_dim = 4, 32, 2, 1

    key = jax.random.PRNGKey(0)
    key, xk, pk = jax.random.split(key, 3)
    x = jax.random.normal(xk, (batch, seq, input_dim), jnp.float32)
    params = init_params(pk, input_dim, hidden_dim, num_layers, output_dim)

    out = lstm_model_forward(x, params)
    out = jax.block_until_ready(out)

    ref = lstm_model_reference(x, params)
    np.testing.assert_allclose(np.asarray(out), np.asarray(ref),
                               rtol=1e-4, atol=1e-5)

    assert out.shape == (batch, output_dim)
    print("KERNEL_OK")
</pallas_src>

<mosaic_0001>
module attributes {stable_mosaic.version = 11 : i64} {
  func.func @_fused_lstm_fc_kernel(%arg0: memref<64x4xf32, #tpu.memory_space<vmem>>, %arg1: memref<4x128xf32, #tpu.memory_space<vmem>>, %arg2: memref<32x128xf32, #tpu.memory_space<vmem>>, %arg3: memref<1x128xf32, #tpu.memory_space<vmem>>, %arg4: memref<32x128xf32, #tpu.memory_space<vmem>>, %arg5: memref<32x128xf32, #tpu.memory_space<vmem>>, %arg6: memref<1x128xf32, #tpu.memory_space<vmem>>, %arg7: memref<32x1xf32, #tpu.memory_space<vmem>>, %arg8: memref<1x1xf32, #tpu.memory_space<vmem>>, %arg9: memref<8x1xf32, #tpu.memory_space<vmem>>, %arg10: memref<64x128xf32, #tpu.memory_space<vmem>>) attributes {dimension_semantics = [], scalar_prefetch = 0 : i64, scratch_operands = 1 : i64, tpu.core_type = #tpu.core_type<tc>} {
    %c0 = arith.constant 0 : index
    %c0_0 = arith.constant 0 : index
    %0 = vector.load %arg1[%c0, %c0_0] : memref<4x128xf32, #tpu.memory_space<vmem>>, vector<4x128xf32>
    %c0_1 = arith.constant 0 : index
    %c0_2 = arith.constant 0 : index
    %1 = vector.load %arg4[%c0_1, %c0_2] : memref<32x128xf32, #tpu.memory_space<vmem>>, vector<32x128xf32>
    %c0_3 = arith.constant 0 : index
    %c0_4 = arith.constant 0 : index
    %2 = vector.load %arg2[%c0_3, %c0_4] : memref<32x128xf32, #tpu.memory_space<vmem>>, vector<32x128xf32>
    %c0_5 = arith.constant 0 : index
    %c0_6 = arith.constant 0 : index
    %3 = vector.load %arg5[%c0_5, %c0_6] : memref<32x128xf32, #tpu.memory_space<vmem>>, vector<32x128xf32>
    %c0_7 = arith.constant 0 : index
    %c0_8 = arith.constant 0 : index
    %4 = vector.load %arg3[%c0_7, %c0_8] : memref<1x128xf32, #tpu.memory_space<vmem>>, vector<1x128xf32>
    %c0_9 = arith.constant 0 : index
    %c0_10 = arith.constant 0 : index
    %5 = vector.load %arg6[%c0_9, %c0_10] : memref<1x128xf32, #tpu.memory_space<vmem>>, vector<1x128xf32>
    %6 = vector.shape_cast %5 : vector<1x128xf32> to vector<1x128xf32>
    %7 = vector.broadcast %6 : vector<1x128xf32> to vector<8x128xf32>
    %c0_11 = arith.constant 0 : index
    %c0_12 = arith.constant 0 : index
    %8 = vector.load %arg0[%c0_11, %c0_12] : memref<64x4xf32, #tpu.memory_space<vmem>>, vector<64x4xf32>
    %cst = arith.constant dense<0.000000e+00> : vector<64x128xf32>
    %9 = tpu.matmul %8, %0, %cst {dimension_numbers = #tpu.dot_dimension_numbers<[1], [0], [0], [1], [0, 0, 1, 1], [], []>} : vector<64x4xf32>, vector<4x128xf32>, vector<64x128xf32> -> vector<64x128xf32>
    %10 = vector.broadcast %4 : vector<1x128xf32> to vector<64x128xf32>
    %11 = arith.addf %9, %10 : vector<64x128xf32>
    %c0_13 = arith.constant 0 : index
    %c0_14 = arith.constant 0 : index
    %12 = vector.load %arg10[%c0_13, %c0_14] : memref<64x128xf32, #tpu.memory_space<vmem>>, vector<64x128xf32>
    tpu.vector_store %arg10[%c0_13, %c0_14], %11 {strides = array<i32>} : memref<64x128xf32, #tpu.memory_space<vmem>>, vector<64x128xf32>,
    %cst_15 = arith.constant 0.000000e+00 : f32
    %13 = vector.broadcast %cst_15 : f32 to vector<8x32xf32>
    %c0_i32 = arith.constant 0 : i32
    %c8_i32 = arith.constant 8 : i32
    %14 = arith.muli %c0_i32, %c8_i32 : i32
    %15 = tpu.assume_multiple %14, 8 : i32
    %16 = arith.index_cast %15 : i32 to index
    %c0_16 = arith.constant 0 : index
    %17 = vector.load %arg10[%16, %c0_16] : memref<64x128xf32, #tpu.memory_space<vmem>>, vector<8x128xf32>
    %cst_17 = arith.constant dense<0.000000e+00> : vector<8x128xf32>
    %18 = tpu.matmul %13, %2, %cst_17 {dimension_numbers = #tpu.dot_dimension_numbers<[1], [0], [0], [1], [0, 0, 1, 1], [], []>} : vector<8x32xf32>, vector<32x128xf32>, vector<8x128xf32> -> vector<8x128xf32>
    %19 = arith.addf %17, %18 : vector<8x128xf32>
    %20 = vector.extract_strided_slice %19 {offsets = [0, 0], sizes = [8, 96], strides = [1, 1]} : vector<8x128xf32> to vector<8x96xf32>
    %cst_18 = arith.constant 5.000000e-01 : f32
    %21 = vector.broadcast %cst_18 : f32 to vector<8x96xf32>
    %22 = arith.mulf %21, %20 : vector<8x96xf32>
    %23 = math.tanh %22 : vector<8x96xf32>
    %cst_19 = arith.constant 5.000000e-01 : f32
    %24 = vector.broadcast %cst_19 : f32 to vector<8x96xf32>
    %25 = arith.mulf %24, %23 : vector<8x96xf32>
    %cst_20 = arith.constant 5.000000e-01 : f32
    %26 = vector.broadcast %cst_20 : f32 to vector<8x96xf32>
    %27 = arith.addf %25, %26 : vector<8x96xf32>
    %28 = vector.extract_strided_slice %19 {offsets = [0, 96], sizes = [8, 32], strides = [1, 1]} : vector<8x128xf32> to vector<8x32xf32>
    %29 = math.tanh %28 : vector<8x32xf32>
    %30 = vector.extract_strided_slice %27 {offsets = [0, 0], sizes = [8, 32], strides = [1, 1]} : vector<8x96xf32> to vector<8x32xf32>
    %31 = vector.extract_strided_slice %27 {offsets = [0, 32], sizes = [8, 32], strides = [1, 1]} : vector<8x96xf32> to vector<8x32xf32>
    %32 = vector.extract_strided_slice %27 {offsets = [0, 64], sizes = [8, 32], strides = [1, 1]} : vector<8x96xf32> to vector<8x32xf32>
    %33 = arith.mulf %31, %13 : vector<8x32xf32>
    %34 = arith.mulf %30, %29 : vector<8x32xf32>
    %35 = arith.addf %33, %34 : vector<8x32xf32>
    %36 = math.tanh %35 : vector<8x32xf32>
    %37 = arith.mulf %32, %36 : vector<8x32xf32>
    %cst_21 = arith.constant dense<0.000000e+00> : vector<8x128xf32>
    %38 = tpu.matmul %37, %1, %cst_21 {dimension_numbers = #tpu.dot_dimension_numbers<[1], [0], [0], [1], [0, 0, 1, 1], [], []>} : vector<8x32xf32>, vector<32x128xf32>, vector<8x128xf32> -> vector<8x128xf32>
    %39 = arith.addf %38, %7 : vector<8x128xf32>
    %cst_22 = arith.constant dense<0.000000e+00> : vector<8x128xf32>
    %40 = tpu.matmul %13, %3, %cst_22 {dimension_numbers = #tpu.dot_dimension_numbers<[1], [0], [0], [1], [0, 0, 1, 1], [], []>} : vector<8x32xf32>, vector<32x128xf32>, vector<8x128xf32> -> vector<8x128xf32>
    %41 = arith.addf %39, %40 : vector<8x128xf32>
    %42 = vector.extract_strided_slice %41 {offsets = [0, 0], sizes = [8, 96], strides = [1, 1]} : vector<8x128xf32> to vector<8x96xf32>
    %cst_23 = arith.constant 5.000000e-01 : f32
    %43 = vector.broadcast %cst_23 : f32 to vector<8x96xf32>
    %44 = arith.mulf %43, %42 : vector<8x96xf32>
    %45 = math.tanh %44 : vector<8x96xf32>
    %cst_24 = arith.constant 5.000000e-01 : f32
    %46 = vector.broadcast %cst_24 : f32 to vector<8x96xf32>
    %47 = arith.mulf %46, %45 : vector<8x96xf32>
    %cst_25 = arith.constant 5.000000e-01 : f32
    %48 = vector.broadcast %cst_25 : f32 to vector<8x96xf32>
    %49 = arith.addf %47, %48 : vector<8x96xf32>
    %50 = vector.extract_strided_slice %41 {offsets = [0, 96], sizes = [8, 32], strides = [1, 1]} : vector<8x128xf32> to vector<8x32xf32>
    %51 = math.tanh %50 : vector<8x32xf32>
    %52 = vector.extract_strided_slice %49 {offsets = [0, 0], sizes = [8, 32], strides = [1, 1]} : vector<8x96xf32> to vector<8x32xf32>
    %53 = vector.extract_strided_slice %49 {offsets = [0, 32], sizes = [8, 32], strides = [1, 1]} : vector<8x96xf32> to vector<8x32xf32>
    %54 = vector.extract_strided_slice %49 {offsets = [0, 64], sizes = [8, 32], strides = [1, 1]} : vector<8x96xf32> to vector<8x32xf32>
    %55 = arith.mulf %53, %13 : vector<8x32xf32>
    %56 = arith.mulf %52, %51 : vector<8x32xf32>
    %57 = arith.addf %55, %56 : vector<8x32xf32>
    %58 = math.tanh %57 : vector<8x32xf32>
    %59 = arith.mulf %54, %58 : vector<8x32xf32>
    %c1_i32 = arith.constant 1 : i32
    %c8_i32_26 = arith.constant 8 : i32
    %60 = arith.muli %c1_i32, %c8_i32_26 : i32
    %61 = tpu.assume_multiple %60, 8 : i32
    %62 = arith.index_cast %61 : i32 to index
    %c0_27 = arith.constant 0 : index
    %63 = vector.load %arg10[%62, %c0_27] : memref<64x128xf32, #tpu.memory_space<vmem>>, vector<8x128xf32>
    %cst_28 = arith.constant dense<0.000000e+00> : vector<8x128xf32>
    %64 = tpu.matmul %37, %2, %cst_28 {dimension_numbers = #tpu.dot_dimension_numbers<[1], [0], [0], [1], [0, 0, 1, 1], [], []>} : vector<8x32xf32>, vector<32x128xf32>, vector<8x128xf32> -> vector<8x128xf32>
    %65 = arith.addf %63, %64 : vector<8x128xf32>
    %66 = vector.extract_strided_slice %65 {offsets = [0, 0], sizes = [8, 96], strides = [1, 1]} : vector<8x128xf32> to vector<8x96xf32>
    %cst_29 = arith.constant 5.000000e-01 : f32
    %67 = vector.broadcast %cst_29 : f32 to vector<8x96xf32>
    %68 = arith.mulf %67, %66 : vector<8x96xf32>
    %69 = math.tanh %68 : vector<8x96xf32>
    %cst_30 = arith.constant 5.000000e-01 : f32
    %70 = vector.broadcast %cst_30 : f32 to vector<8x96xf32>
    %71 = arith.mulf %70, %69 : vector<8x96xf32>
    %cst_31 = arith.constant 5.000000e-01 : f32
    %72 = vector.broadcast %cst_31 : f32 to vector<8x96xf32>
    %73 = arith.addf %71, %72 : vector<8x96xf32>
    %74 = vector.extract_strided_slice %65 {offsets = [0, 96], sizes = [8, 32], strides = [1, 1]} : vector<8x128xf32> to vector<8x32xf32>
    %75 = math.tanh %74 : vector<8x32xf32>
    %76 = vector.extract_strided_slice %73 {offsets = [0, 0], sizes = [8, 32], strides = [1, 1]} : vector<8x96xf32> to vector<8x32xf32>
    %77 = vector.extract_strided_slice %73 {offsets = [0, 32], sizes = [8, 32], strides = [1, 1]} : vector<8x96xf32> to vector<8x32xf32>
    %78 = vector.extract_strided_slice %73 {offsets = [0, 64], sizes = [8, 32], strides = [1, 1]} : vector<8x96xf32> to vector<8x32xf32>
    %79 = arith.mulf %77, %35 : vector<8x32xf32>
    %80 = arith.mulf %76, %75 : vector<8x32xf32>
    %81 = arith.addf %79, %80 : vector<8x32xf32>
    %82 = math.tanh %81 : vector<8x32xf32>
    %83 = arith.mulf %78, %82 : vector<8x32xf32>
    %cst_32 = arith.constant dense<0.000000e+00> : vector<8x128xf32>
    %84 = tpu.matmul %83, %1, %cst_32 {dimension_numbers = #tpu.dot_dimension_numbers<[1], [0], [0], [1], [0, 0, 1, 1], [], []>} : vector<8x32xf32>, vector<32x128xf32>, vector<8x128xf32> -> vector<8x128xf32>
    %85 = arith.addf %84, %7 : vector<8x128xf32>
    %cst_33 = arith.constant dense<0.000000e+00> : vector<8x128xf32>
    %86 = tpu.matmul %59, %3, %cst_33 {dimension_numbers = #tpu.dot_dimension_numbers<[1], [0], [0], [1], [0, 0, 1, 1], [], []>} : vector<8x32xf32>, vector<32x128xf32>, vector<8x128xf32> -> vector<8x128xf32>
    %87 = arith.addf %85, %86 : vector<8x128xf32>
    %88 = vector.extract_strided_slice %87 {offsets = [0, 0], sizes = [8, 96], strides = [1, 1]} : vector<8x128xf32> to vector<8x96xf32>
    %cst_34 = arith.constant 5.000000e-01 : f32
    %89 = vector.broadcast %cst_34 : f32 to vector<8x96xf32>
    %90 = arith.mulf %89, %88 : vector<8x96xf32>
    %91 = math.tanh %90 : vector<8x96xf32>
    %cst_35 = arith.constant 5.000000e-01 : f32
    %92 = vector.broadcast %cst_35 : f32 to vector<8x96xf32>
    %93 = arith.mulf %92, %91 : vector<8x96xf32>
    %cst_36 = arith.constant 5.000000e-01 : f32
    %94 = vector.broadcast %cst_36 : f32 to vector<8x96xf32>
    %95 = arith.addf %93, %94 : vector<8x96xf32>
    %96 = vector.extract_strided_slice %87 {offsets = [0, 96], sizes = [8, 32], strides = [1, 1]} : vector<8x128xf32> to vector<8x32xf32>
    %97 = math.tanh %96 : vector<8x32xf32>
    %98 = vector.extract_strided_slice %95 {offsets = [0, 0], sizes = [8, 32], strides = [1, 1]} : vector<8x96xf32> to vector<8x32xf32>
    %99 = vector.extract_strided_slice %95 {offsets = [0, 32], sizes = [8, 32], strides = [1, 1]} : vector<8x96xf32> to vector<8x32xf32>
    %100 = vector.extract_strided_slice %95 {offsets = [0, 64], sizes = [8, 32], strides = [1, 1]} : vector<8x96xf32> to vector<8x32xf32>
    %101 = arith.mulf %99, %57 : vector<8x32xf32>
    %102 = arith.mulf %98, %97 : vector<8x32xf32>
    %103 = arith.addf %101, %102 : vector<8x32xf32>
    %104 = math.tanh %103 : vector<8x32xf32>
    %105 = arith.mulf %100, %104 : vector<8x32xf32>
    %c2_i32 = arith.constant 2 : i32
    %c8_i32_37 = arith.constant 8 : i32
    %106 = arith.muli %c2_i32, %c8_i32_37 : i32
    %107 = tpu.assume_multiple %106, 8 : i32
    %108 = arith.index_cast %107 : i32 to index
    %c0_38 = arith.constant 0 : index
    %109 = vector.load %arg10[%108, %c0_38] : memref<64x128xf32, #tpu.memory_space<vmem>>, vector<8x128xf32>
    %cst_39 = arith.constant dense<0.000000e+00> : vector<8x128xf32>
    %110 = tpu.matmul %83, %2, %cst_39 {dimension_numbers = #tpu.dot_dimension_numbers<[1], [0], [0], [1], [0, 0, 1, 1], [], []>} : vector<8x32xf32>, vector<32x128xf32>, vector<8x128xf32> -> vector<8x128xf32>
    %111 = arith.addf %109, %110 : vector<8x128xf32>
    %112 = vector.extract_strided_slice %111 {offsets = [0, 0], sizes = [8, 96], strides = [1, 1]} : vector<8x128xf32> to vector<8x96xf32>
    %cst_40 = arith.constant 5.000000e-01 : f32
    %113 = vector.broadcast %cst_40 : f32 to vector<8x96xf32>
    %114 = arith.mulf %113, %112 : vector<8x96xf32>
    %115 = math.tanh %114 : vector<8x96xf32>
    %cst_41 = arith.constant 5.000000e-01 : f32
    %116 = vector.broadcast %cst_41 : f32 to vector<8x96xf32>
    %117 = arith.mulf %116, %115 : vector<8x96xf32>
    %cst_42 = arith.constant 5.000000e-01 : f32
    %118 = vector.broadcast %cst_42 : f32 to vector<8x96xf32>
    %119 = arith.addf %117, %118 : vector<8x96xf32>
    %120 = vector.extract_strided_slice %111 {offsets = [0, 96], sizes = [8, 32], strides = [1, 1]} : vector<8x128xf32> to vector<8x32xf32>
    %121 = math.tanh %120 : vector<8x32xf32>
    %122 = vector.extract_strided_slice %119 {offsets = [0, 0], sizes = [8, 32], strides = [1, 1]} : vector<8x96xf32> to vector<8x32xf32>
    %123 = vector.extract_strided_slice %119 {offsets = [0, 32], sizes = [8, 32], strides = [1, 1]} : vector<8x96xf32> to vector<8x32xf32>
    %124 = vector.extract_strided_slice %119 {offsets = [0, 64], sizes = [8, 32], strides = [1, 1]} : vector<8x96xf32> to vector<8x32xf32>
    %125 = arith.mulf %123, %81 : vector<8x32xf32>
    %126 = arith.mulf %122, %121 : vector<8x32xf32>
    %127 = arith.addf %125, %126 : vector<8x32xf32>
    %128 = math.tanh %127 : vector<8x32xf32>
    %129 = arith.mulf %124, %128 : vector<8x32xf32>
    %cst_43 = arith.constant dense<0.000000e+00> : vector<8x128xf32>
    %130 = tpu.matmul %129, %1, %cst_43 {dimension_numbers = #tpu.dot_dimension_numbers<[1], [0], [0], [1], [0, 0, 1, 1], [], []>} : vector<8x32xf32>, vector<32x128xf32>, vector<8x128xf32> -> vector<8x128xf32>
    %131 = arith.addf %130, %7 : vector<8x128xf32>
    %cst_44 = arith.constant dense<0.000000e+00> : vector<8x128xf32>
    %132 = tpu.matmul %105, %3, %cst_44 {dimension_numbers = #tpu.dot_dimension_numbers<[1], [0], [0], [1], [0, 0, 1, 1], [], []>} : vector<8x32xf32>, vector<32x128xf32>, vector<8x128xf32> -> vector<8x128xf32>
    %133 = arith.addf %131, %132 : vector<8x128xf32>
    %134 = vector.extract_strided_slice %133 {offsets = [0, 0], sizes = [8, 96], strides = [1, 1]} : vector<8x128xf32> to vector<8x96xf32>
    %cst_45 = arith.constant 5.000000e-01 : f32
    %135 = vector.broadcast %cst_45 : f32 to vector<8x96xf32>
    %136 = arith.mulf %135, %134 : vector<8x96xf32>
    %137 = math.tanh %136 : vector<8x96xf32>
    %cst_46 = arith.constant 5.000000e-01 : f32
    %138 = vector.broadcast %cst_46 : f32 to vector<8x96xf32>
    %139 = arith.mulf %138, %137 : vector<8x96xf32>
    %cst_47 = arith.constant 5.000000e-01 : f32
    %140 = vector.broadcast %cst_47 : f32 to vector<8x96xf32>
    %141 = arith.addf %139, %140 : vector<8x96xf32>
    %142 = vector.extract_strided_slice %133 {offsets = [0, 96], sizes = [8, 32], strides = [1, 1]} : vector<8x128xf32> to vector<8x32xf32>
    %143 = math.tanh %142 : vector<8x32xf32>
    %144 = vector.extract_strided_slice %141 {offsets = [0, 0], sizes = [8, 32], strides = [1, 1]} : vector<8x96xf32> to vector<8x32xf32>
    %145 = vector.extract_strided_slice %141 {offsets = [0, 32], sizes = [8, 32], strides = [1, 1]} : vector<8x96xf32> to vector<8x32xf32>
    %146 = vector.extract_strided_slice %141 {offsets = [0, 64], sizes = [8, 32], strides = [1, 1]} : vector<8x96xf32> to vector<8x32xf32>
    %147 = arith.mulf %145, %103 : vector<8x32xf32>
    %148 = arith.mulf %144, %143 : vector<8x32xf32>
    %149 = arith.addf %147, %148 : vector<8x32xf32>
    %150 = math.tanh %149 : vector<8x32xf32>
    %151 = arith.mulf %146, %150 : vector<8x32xf32>
    %c3_i32 = arith.constant 3 : i32
    %c8_i32_48 = arith.constant 8 : i32
    %152 = arith.muli %c3_i32, %c8_i32_48 : i32
    %153 = tpu.assume_multiple %152, 8 : i32
    %154 = arith.index_cast %153 : i32 to index
    %c0_49 = arith.constant 0 : index
    %155 = vector.load %arg10[%154, %c0_49] : memref<64x128xf32, #tpu.memory_space<vmem>>, vector<8x128xf32>
    %cst_50 = arith.constant dense<0.000000e+00> : vector<8x128xf32>
    %156 = tpu.matmul %129, %2, %cst_50 {dimension_numbers = #tpu.dot_dimension_numbers<[1], [0], [0], [1], [0, 0, 1, 1], [], []>} : vector<8x32xf32>, vector<32x128xf32>, vector<8x128xf32> -> vector<8x128xf32>
    %157 = arith.addf %155, %156 : vector<8x128xf32>
    %158 = vector.extract_strided_slice %157 {offsets = [0, 0], sizes = [8, 96], strides = [1, 1]} : vector<8x128xf32> to vector<8x96xf32>
    %cst_51 = arith.constant 5.000000e-01 : f32
    %159 = vector.broadcast %cst_51 : f32 to vector<8x96xf32>
    %160 = arith.mulf %159, %158 : vector<8x96xf32>
    %161 = math.tanh %160 : vector<8x96xf32>
    %cst_52 = arith.constant 5.000000e-01 : f32
    %162 = vector.broadcast %cst_52 : f32 to vector<8x96xf32>
    %163 = arith.mulf %162, %161 : vector<8x96xf32>
    %cst_53 = arith.constant 5.000000e-01 : f32
    %164 = vector.broadcast %cst_53 : f32 to vector<8x96xf32>
    %165 = arith.addf %163, %164 : vector<8x96xf32>
    %166 = vector.extract_strided_slice %157 {offsets = [0, 96], sizes = [8, 32], strides = [1, 1]} : vector<8x128xf32> to vector<8x32xf32>
    %167 = math.tanh %166 : vector<8x32xf32>
    %168 = vector.extract_strided_slice %165 {offsets = [0, 0], sizes = [8, 32], strides = [1, 1]} : vector<8x96xf32> to vector<8x32xf32>
    %169 = vector.extract_strided_slice %165 {offsets = [0, 32], sizes = [8, 32], strides = [1, 1]} : vector<8x96xf32> to vector<8x32xf32>
    %170 = vector.extract_strided_slice %165 {offsets = [0, 64], sizes = [8, 32], strides = [1, 1]} : vector<8x96xf32> to vector<8x32xf32>
    %171 = arith.mulf %169, %127 : vector<8x32xf32>
    %172 = arith.mulf %168, %167 : vector<8x32xf32>
    %173 = arith.addf %171, %172 : vector<8x32xf32>
    %174 = math.tanh %173 : vector<8x32xf32>
    %175 = arith.mulf %170, %174 : vector<8x32xf32>
    %cst_54 = arith.constant dense<0.000000e+00> : vector<8x128xf32>
    %176 = tpu.matmul %175, %1, %cst_54 {dimension_numbers = #tpu.dot_dimension_numbers<[1], [0], [0], [1], [0, 0, 1, 1], [], []>} : vector<8x32xf32>, vector<32x128xf32>, vector<8x128xf32> -> vector<8x128xf32>
    %177 = arith.addf %176, %7 : vector<8x128xf32>
    %cst_55 = arith.constant dense<0.000000e+00> : vector<8x128xf32>
    %178 = tpu.matmul %151, %3, %cst_55 {dimension_numbers = #tpu.dot_dimension_numbers<[1], [0], [0], [1], [0, 0, 1, 1], [], []>} : vector<8x32xf32>, vector<32x128xf32>, vector<8x128xf32> -> vector<8x128xf32>
    %179 = arith.addf %177, %178 : vector<8x128xf32>
    %180 = vector.extract_strided_slice %179 {offsets = [0, 0], sizes = [8, 96], strides = [1, 1]} : vector<8x128xf32> to vector<8x96xf32>
    %cst_56 = arith.constant 5.000000e-01 : f32
    %181 = vector.broadcast %cst_56 : f32 to vector<8x96xf32>
    %182 = arith.mulf %181, %180 : vector<8x96xf32>
    %183 = math.tanh %182 : vector<8x96xf32>
    %cst_57 = arith.constant 5.000000e-01 : f32
    %184 = vector.broadcast %cst_57 : f32 to vector<8x96xf32>
    %185 = arith.mulf %184, %183 : vector<8x96xf32>
    %cst_58 = arith.constant 5.000000e-01 : f32
    %186 = vector.broadcast %cst_58 : f32 to vector<8x96xf32>
    %187 = arith.addf %185, %186 : vector<8x96xf32>
    %188 = vector.extract_strided_slice %179 {offsets = [0, 96], sizes = [8, 32], strides = [1, 1]} : vector<8x128xf32> to vector<8x32xf32>
    %189 = math.tanh %188 : vector<8x32xf32>
    %190 = vector.extract_strided_slice %187 {offsets = [0, 0], sizes = [8, 32], strides = [1, 1]} : vector<8x96xf32> to vector<8x32xf32>
    %191 = vector.extract_strided_slice %187 {offsets = [0, 32], sizes = [8, 32], strides = [1, 1]} : vector<8x96xf32> to vector<8x32xf32>
    %192 = vector.extract_strided_slice %187 {offsets = [0, 64], sizes = [8, 32], strides = [1, 1]} : vector<8x96xf32> to vector<8x32xf32>
    %193 = arith.mulf %191, %149 : vector<8x32xf32>
    %194 = arith.mulf %190, %189 : vector<8x32xf32>
    %195 = arith.addf %193, %194 : vector<8x32xf32>
    %196 = math.tanh %195 : vector<8x32xf32>
    %197 = arith.mulf %192, %196 : vector<8x32xf32>
    %c4_i32 = arith.constant 4 : i32
    %c8_i32_59 = arith.constant 8 : i32
    %198 = arith.muli %c4_i32, %c8_i32_59 : i32
    %199 = tpu.assume_multiple %198, 8 : i32
    %200 = arith.index_cast %199 : i32 to index
    %c0_60 = arith.constant 0 : index
    %201 = vector.load %arg10[%200, %c0_60] : memref<64x128xf32, #tpu.memory_space<vmem>>, vector<8x128xf32>
    %cst_61 = arith.constant dense<0.000000e+00> : vector<8x128xf32>
    %202 = tpu.matmul %175, %2, %cst_61 {dimension_numbers = #tpu.dot_dimension_numbers<[1], [0], [0], [1], [0, 0, 1, 1], [], []>} : vector<8x32xf32>, vector<32x128xf32>, vector<8x128xf32> -> vector<8x128xf32>
    %203 = arith.addf %201, %202 : vector<8x128xf32>
    %204 = vector.extract_strided_slice %203 {offsets = [0, 0], sizes = [8, 96], strides = [1, 1]} : vector<8x128xf32> to vector<8x96xf32>
    %cst_62 = arith.constant 5.000000e-01 : f32
    %205 = vector.broadcast %cst_62 : f32 to vector<8x96xf32>
    %206 = arith.mulf %205, %204 : vector<8x96xf32>
    %207 = math.tanh %206 : vector<8x96xf32>
    %cst_63 = arith.constant 5.000000e-01 : f32
    %208 = vector.broadcast %cst_63 : f32 to vector<8x96xf32>
    %209 = arith.mulf %208, %207 : vector<8x96xf32>
    %cst_64 = arith.constant 5.000000e-01 : f32
    %210 = vector.broadcast %cst_64 : f32 to vector<8x96xf32>
    %211 = arith.addf %209, %210 : vector<8x96xf32>
    %212 = vector.extract_strided_slice %203 {offsets = [0, 96], sizes = [8, 32], strides = [1, 1]} : vector<8x128xf32> to vector<8x32xf32>
    %213 = math.tanh %212 : vector<8x32xf32>
    %214 = vector.extract_strided_slice %211 {offsets = [0, 0], sizes = [8, 32], strides = [1, 1]} : vector<8x96xf32> to vector<8x32xf32>
    %215 = vector.extract_strided_slice %211 {offsets = [0, 32], sizes = [8, 32], strides = [1, 1]} : vector<8x96xf32> to vector<8x32xf32>
    %216 = vector.extract_strided_slice %211 {offsets = [0, 64], sizes = [8, 32], strides = [1, 1]} : vector<8x96xf32> to vector<8x32xf32>
    %217 = arith.mulf %215, %173 : vector<8x32xf32>
    %218 = arith.mulf %214, %213 : vector<8x32xf32>
    %219 = arith.addf %217, %218 : vector<8x32xf32>
    %220 = math.tanh %219 : vector<8x32xf32>
    %221 = arith.mulf %216, %220 : vector<8x32xf32>
    %cst_65 = arith.constant dense<0.000000e+00> : vector<8x128xf32>
    %222 = tpu.matmul %221, %1, %cst_65 {dimension_numbers = #tpu.dot_dimension_numbers<[1], [0], [0], [1], [0, 0, 1, 1], [], []>} : vector<8x32xf32>, vector<32x128xf32>, vector<8x128xf32> -> vector<8x128xf32>
    %223 = arith.addf %222, %7 : vector<8x128xf32>
    %cst_66 = arith.constant dense<0.000000e+00> : vector<8x128xf32>
    %224 = tpu.matmul %197, %3, %cst_66 {dimension_numbers = #tpu.dot_dimension_numbers<[1], [0], [0], [1], [0, 0, 1, 1], [], []>} : vector<8x32xf32>, vector<32x128xf32>, vector<8x128xf32> -> vector<8x128xf32>
    %225 = arith.addf %223, %224 : vector<8x128xf32>
    %226 = vector.extract_strided_slice %225 {offsets = [0, 0], sizes = [8, 96], strides = [1, 1]} : vector<8x128xf32> to vector<8x96xf32>
    %cst_67 = arith.constant 5.000000e-01 : f32
    %227 = vector.broadcast %cst_67 : f32 to vector<8x96xf32>
    %228 = arith.mulf %227, %226 : vector<8x96xf32>
    %229 = math.tanh %228 : vector<8x96xf32>
    %cst_68 = arith.constant 5.000000e-01 : f32
    %230 = vector.broadcast %cst_68 : f32 to vector<8x96xf32>
    %231 = arith.mulf %230, %229 : vector<8x96xf32>
    %cst_69 = arith.constant 5.000000e-01 : f32
    %232 = vector.broadcast %cst_69 : f32 to vector<8x96xf32>
    %233 = arith.addf %231, %232 : vector<8x96xf32>
    %234 = vector.extract_strided_slice %225 {offsets = [0, 96], sizes = [8, 32], strides = [1, 1]} : vector<8x128xf32> to vector<8x32xf32>
    %235 = math.tanh %234 : vector<8x32xf32>
    %236 = vector.extract_strided_slice %233 {offsets = [0, 0], sizes = [8, 32], strides = [1, 1]} : vector<8x96xf32> to vector<8x32xf32>
    %237 = vector.extract_strided_slice %233 {offsets = [0, 32], sizes = [8, 32], strides = [1, 1]} : vector<8x96xf32> to vector<8x32xf32>
    %238 = vector.extract_strided_slice %233 {offsets = [0, 64], sizes = [8, 32], strides = [1, 1]} : vector<8x96xf32> to vector<8x32xf32>
    %239 = arith.mulf %237, %195 : vector<8x32xf32>
    %240 = arith.mulf %236, %235 : vector<8x32xf32>
    %241 = arith.addf %239, %240 : vector<8x32xf32>
    %242 = math.tanh %241 : vector<8x32xf32>
    %243 = arith.mulf %238, %242 : vector<8x32xf32>
    %c5_i32 = arith.constant 5 : i32
    %c8_i32_70 = arith.constant 8 : i32
    %244 = arith.muli %c5_i32, %c8_i32_70 : i32
    %245 = tpu.assume_multiple %244, 8 : i32
    %246 = arith.index_cast %245 : i32 to index
    %c0_71 = arith.constant 0 : index
    %247 = vector.load %arg10[%246, %c0_71] : memref<64x128xf32, #tpu.memory_space<vmem>>, vector<8x128xf32>
    %cst_72 = arith.constant dense<0.000000e+00> : vector<8x128xf32>
    %248 = tpu.matmul %221, %2, %cst_72 {dimension_numbers = #tpu.dot_dimension_numbers<[1], [0], [0], [1], [0, 0, 1, 1], [], []>} : vector<8x32xf32>, vector<32x128xf32>, vector<8x128xf32> -> vector<8x128xf32>
    %249 = arith.addf %247, %248 : vector<8x128xf32>
    %250 = vector.extract_strided_slice %249 {offsets = [0, 0], sizes = [8, 96], strides = [1, 1]} : vector<8x128xf32> to vector<8x96xf32>
    %cst_73 = arith.constant 5.000000e-01 : f32
    %251 = vector.broadcast %cst_73 : f32 to vector<8x96xf32>
    %252 = arith.mulf %251, %250 : vector<8x96xf32>
    %253 = math.tanh %252 : vector<8x96xf32>
    %cst_74 = arith.constant 5.000000e-01 : f32
    %254 = vector.broadcast %cst_74 : f32 to vector<8x96xf32>
    %255 = arith.mulf %254, %253 : vector<8x96xf32>
    %cst_75 = arith.constant 5.000000e-01 : f32
    %256 = vector.broadcast %cst_75 : f32 to vector<8x96xf32>
    %257 = arith.addf %255, %256 : vector<8x96xf32>
    %258 = vector.extract_strided_slice %249 {offsets = [0, 96], sizes = [8, 32], strides = [1, 1]} : vector<8x128xf32> to vector<8x32xf32>
    %259 = math.tanh %258 : vector<8x32xf32>
    %260 = vector.extract_strided_slice %257 {offsets = [0, 0], sizes = [8, 32], strides = [1, 1]} : vector<8x96xf32> to vector<8x32xf32>
    %261 = vector.extract_strided_slice %257 {offsets = [0, 32], sizes = [8, 32], strides = [1, 1]} : vector<8x96xf32> to vector<8x32xf32>
    %262 = vector.extract_strided_slice %257 {offsets = [0, 64], sizes = [8, 32], strides = [1, 1]} : vector<8x96xf32> to vector<8x32xf32>
    %263 = arith.mulf %261, %219 : vector<8x32xf32>
    %264 = arith.mulf %260, %259 : vector<8x32xf32>
    %265 = arith.addf %263, %264 : vector<8x32xf32>
    %266 = math.tanh %265 : vector<8x32xf32>
    %267 = arith.mulf %262, %266 : vector<8x32xf32>
    %cst_76 = arith.constant dense<0.000000e+00> : vector<8x128xf32>
    %268 = tpu.matmul %267, %1, %cst_76 {dimension_numbers = #tpu.dot_dimension_numbers<[1], [0], [0], [1], [0, 0, 1, 1], [], []>} : vector<8x32xf32>, vector<32x128xf32>, vector<8x128xf32> -> vector<8x128xf32>
    %269 = arith.addf %268, %7 : vector<8x128xf32>
    %cst_77 = arith.constant dense<0.000000e+00> : vector<8x128xf32>
    %270 = tpu.matmul %243, %3, %cst_77 {dimension_numbers = #tpu.dot_dimension_numbers<[1], [0], [0], [1], [0, 0, 1, 1], [], []>} : vector<8x32xf32>, vector<32x128xf32>, vector<8x128xf32> -> vector<8x128xf32>
    %271 = arith.addf %269, %270 : vector<8x128xf32>
    %272 = vector.extract_strided_slice %271 {offsets = [0, 0], sizes = [8, 96], strides = [1, 1]} : vector<8x128xf32> to vector<8x96xf32>
    %cst_78 = arith.constant 5.000000e-01 : f32
    %273 = vector.broadcast %cst_78 : f32 to vector<8x96xf32>
    %274 = arith.mulf %273, %272 : vector<8x96xf32>
    %275 = math.tanh %274 : vector<8x96xf32>
    %cst_79 = arith.constant 5.000000e-01 : f32
    %276 = vector.broadcast %cst_79 : f32 to vector<8x96xf32>
    %277 = arith.mulf %276, %275 : vector<8x96xf32>
    %cst_80 = arith.constant 5.000000e-01 : f32
    %278 = vector.broadcast %cst_80 : f32 to vector<8x96xf32>
    %279 = arith.addf %277, %278 : vector<8x96xf32>
    %280 = vector.extract_strided_slice %271 {offsets = [0, 96], sizes = [8, 32], strides = [1, 1]} : vector<8x128xf32> to vector<8x32xf32>
    %281 = math.tanh %280 : vector<8x32xf32>
    %282 = vector.extract_strided_slice %279 {offsets = [0, 0], sizes = [8, 32], strides = [1, 1]} : vector<8x96xf32> to vector<8x32xf32>
    %283 = vector.extract_strided_slice %279 {offsets = [0, 32], sizes = [8, 32], strides = [1, 1]} : vector<8x96xf32> to vector<8x32xf32>
    %284 = vector.extract_strided_slice %279 {offsets = [0, 64], sizes = [8, 32], strides = [1, 1]} : vector<8x96xf32> to vector<8x32xf32>
    %285 = arith.mulf %283, %241 : vector<8x32xf32>
    %286 = arith.mulf %282, %281 : vector<8x32xf32>
    %287 = arith.addf %285, %286 : vector<8x32xf32>
    %288 = math.tanh %287 : vector<8x32xf32>
    %289 = arith.mulf %284, %288 : vector<8x32xf32>
    %c6_i32 = arith.constant 6 : i32
    %c8_i32_81 = arith.constant 8 : i32
    %290 = arith.muli %c6_i32, %c8_i32_81 : i32
    %291 = tpu.assume_multiple %290, 8 : i32
    %292 = arith.index_cast %291 : i32 to index
    %c0_82 = arith.constant 0 : index
    %293 = vector.load %arg10[%292, %c0_82] : memref<64x128xf32, #tpu.memory_space<vmem>>, vector<8x128xf32>
    %cst_83 = arith.constant dense<0.000000e+00> : vector<8x128xf32>
    %294 = tpu.matmul %267, %2, %cst_83 {dimension_numbers = #tpu.dot_dimension_numbers<[1], [0], [0], [1], [0, 0, 1, 1], [], []>} : vector<8x32xf32>, vector<32x128xf32>, vector<8x128xf32> -> vector<8x128xf32>
    %295 = arith.addf %293, %294 : vector<8x128xf32>
    %296 = vector.extract_strided_slice %295 {offsets = [0, 0], sizes = [8, 96], strides = [1, 1]} : vector<8x128xf32> to vector<8x96xf32>
    %cst_84 = arith.constant 5.000000e-01 : f32
    %297 = vector.broadcast %cst_84 : f32 to vector<8x96xf32>
    %298 = arith.mulf %297, %296 : vector<8x96xf32>
    %299 = math.tanh %298 : vector<8x96xf32>
    %cst_85 = arith.constant 5.000000e-01 : f32
    %300 = vector.broadcast %cst_85 : f32 to vector<8x96xf32>
    %301 = arith.mulf %300, %299 : vector<8x96xf32>
    %cst_86 = arith.constant 5.000000e-01 : f32
    %302 = vector.broadcast %cst_86 : f32 to vector<8x96xf32>
    %303 = arith.addf %301, %302 : vector<8x96xf32>
    %304 = vector.extract_strided_slice %295 {offsets = [0, 96], sizes = [8, 32], strides = [1, 1]} : vector<8x128xf32> to vector<8x32xf32>
    %305 = math.tanh %304 : vector<8x32xf32>
    %306 = vector.extract_strided_slice %303 {offsets = [0, 0], sizes = [8, 32], strides = [1, 1]} : vector<8x96xf32> to vector<8x32xf32>
    %307 = vector.extract_strided_slice %303 {offsets = [0, 32], sizes = [8, 32], strides = [1, 1]} : vector<8x96xf32> to vector<8x32xf32>
    %308 = vector.extract_strided_slice %303 {offsets = [0, 64], sizes = [8, 32], strides = [1, 1]} : vector<8x96xf32> to vector<8x32xf32>
    %309 = arith.mulf %307, %265 : vector<8x32xf32>
    %310 = arith.mulf %306, %305 : vector<8x32xf32>
    %311 = arith.addf %309, %310 : vector<8x32xf32>
    %312 = math.tanh %311 : vector<8x32xf32>
    %313 = arith.mulf %308, %312 : vector<8x32xf32>
    %cst_87 = arith.constant dense<0.000000e+00> : vector<8x128xf32>
    %314 = tpu.matmul %313, %1, %cst_87 {dimension_numbers = #tpu.dot_dimension_numbers<[1], [0], [0], [1], [0, 0, 1, 1], [], []>} : vector<8x32xf32>, vector<32x128xf32>, vector<8x128xf32> -> vector<8x128xf32>
    %315 = arith.addf %314, %7 : vector<8x128xf32>
    %cst_88 = arith.constant dense<0.000000e+00> : vector<8x128xf32>
    %316 = tpu.matmul %289, %3, %cst_88 {dimension_numbers = #tpu.dot_dimension_numbers<[1], [0], [0], [1], [0, 0, 1, 1], [], []>} : vector<8x32xf32>, vector<32x128xf32>, vector<8x128xf32> -> vector<8x128xf32>
    %317 = arith.addf %315, %316 : vector<8x128xf32>
    %318 = vector.extract_strided_slice %317 {offsets = [0, 0], sizes = [8, 96], strides = [1, 1]} : vector<8x128xf32> to vector<8x96xf32>
    %cst_89 = arith.constant 5.000000e-01 : f32
    %319 = vector.broadcast %cst_89 : f32 to vector<8x96xf32>
    %320 = arith.mulf %319, %318 : vector<8x96xf32>
    %321 = math.tanh %320 : vector<8x96xf32>
    %cst_90 = arith.constant 5.000000e-01 : f32
    %322 = vector.broadcast %cst_90 : f32 to vector<8x96xf32>
    %323 = arith.mulf %322, %321 : vector<8x96xf32>
    %cst_91 = arith.constant 5.000000e-01 : f32
    %324 = vector.broadcast %cst_91 : f32 to vector<8x96xf32>
    %325 = arith.addf %323, %324 : vector<8x96xf32>
    %326 = vector.extract_strided_slice %317 {offsets = [0, 96], sizes = [8, 32], strides = [1, 1]} : vector<8x128xf32> to vector<8x32xf32>
    %327 = math.tanh %326 : vector<8x32xf32>
    %328 = vector.extract_strided_slice %325 {offsets = [0, 0], sizes = [8, 32], strides = [1, 1]} : vector<8x96xf32> to vector<8x32xf32>
    %329 = vector.extract_strided_slice %325 {offsets = [0, 32], sizes = [8, 32], strides = [1, 1]} : vector<8x96xf32> to vector<8x32xf32>
    %330 = vector.extract_strided_slice %325 {offsets = [0, 64], sizes = [8, 32], strides = [1, 1]} : vector<8x96xf32> to vector<8x32xf32>
    %331 = arith.mulf %329, %287 : vector<8x32xf32>
    %332 = arith.mulf %328, %327 : vector<8x32xf32>
    %333 = arith.addf %331, %332 : vector<8x32xf32>
    %334 = math.tanh %333 : vector<8x32xf32>
    %335 = arith.mulf %330, %334 : vector<8x32xf32>
    %c7_i32 = arith.constant 7 : i32
    %c8_i32_92 = arith.constant 8 : i32
    %336 = arith.muli %c7_i32, %c8_i32_92 : i32
    %337 = tpu.assume_multiple %336, 8 : i32
    %338 = arith.index_cast %337 : i32 to index
    %c0_93 = arith.constant 0 : index
    %339 = vector.load %arg10[%338, %c0_93] : memref<64x128xf32, #tpu.memory_space<vmem>>, vector<8x128xf32>
    %cst_94 = arith.constant dense<0.000000e+00> : vector<8x128xf32>
    %340 = tpu.matmul %313, %2, %cst_94 {dimension_numbers = #tpu.dot_dimension_numbers<[1], [0], [0], [1], [0, 0, 1, 1], [], []>} : vector<8x32xf32>, vector<32x128xf32>, vector<8x128xf32> -> vector<8x128xf32>
    %341 = arith.addf %339, %340 : vector<8x128xf32>
    %342 = vector.extract_strided_slice %341 {offsets = [0, 0], sizes = [8, 96], strides = [1, 1]} : vector<8x128xf32> to vector<8x96xf32>
    %cst_95 = arith.constant 5.000000e-01 : f32
    %343 = vector.broadcast %cst_95 : f32 to vector<8x96xf32>
    %344 = arith.mulf %343, %342 : vector<8x96xf32>
    %345 = math.tanh %344 : vector<8x96xf32>
    %cst_96 = arith.constant 5.000000e-01 : f32
    %346 = vector.broadcast %cst_96 : f32 to vector<8x96xf32>
    %347 = arith.mulf %346, %345 : vector<8x96xf32>
    %cst_97 = arith.constant 5.000000e-01 : f32
    %348 = vector.broadcast %cst_97 : f32 to vector<8x96xf32>
    %349 = arith.addf %347, %348 : vector<8x96xf32>
    %350 = vector.extract_strided_slice %341 {offsets = [0, 96], sizes = [8, 32], strides = [1, 1]} : vector<8x128xf32> to vector<8x32xf32>
    %351 = math.tanh %350 : vector<8x32xf32>
    %352 = vector.extract_strided_slice %349 {offsets = [0, 0], sizes = [8, 32], strides = [1, 1]} : vector<8x96xf32> to vector<8x32xf32>
    %353 = vector.extract_strided_slice %349 {offsets = [0, 32], sizes = [8, 32], strides = [1, 1]} : vector<8x96xf32> to vector<8x32xf32>
    %354 = vector.extract_strided_slice %349 {offsets = [0, 64], sizes = [8, 32], strides = [1, 1]} : vector<8x96xf32> to vector<8x32xf32>
    %355 = arith.mulf %353, %311 : vector<8x32xf32>
    %356 = arith.mulf %352, %351 : vector<8x32xf32>
    %357 = arith.addf %355, %356 : vector<8x32xf32>
    %358 = math.tanh %357 : vector<8x32xf32>
    %359 = arith.mulf %354, %358 : vector<8x32xf32>
    %cst_98 = arith.constant dense<0.000000e+00> : vector<8x128xf32>
    %360 = tpu.matmul %359, %1, %cst_98 {dimension_numbers = #tpu.dot_dimension_numbers<[1], [0], [0], [1], [0, 0, 1, 1], [], []>} : vector<8x32xf32>, vector<32x128xf32>, vector<8x128xf32> -> vector<8x128xf32>
    %361 = arith.addf %360, %7 : vector<8x128xf32>
    %cst_99 = arith.constant dense<0.000000e+00> : vector<8x128xf32>
    %362 = tpu.matmul %335, %3, %cst_99 {dimension_numbers = #tpu.dot_dimension_numbers<[1], [0], [0], [1], [0, 0, 1, 1], [], []>} : vector<8x32xf32>, vector<32x128xf32>, vector<8x128xf32> -> vector<8x128xf32>
    %363 = arith.addf %361, %362 : vector<8x128xf32>
    %364 = vector.extract_strided_slice %363 {offsets = [0, 0], sizes = [8, 96], strides = [1, 1]} : vector<8x128xf32> to vector<8x96xf32>
    %cst_100 = arith.constant 5.000000e-01 : f32
    %365 = vector.broadcast %cst_100 : f32 to vector<8x96xf32>
    %366 = arith.mulf %365, %364 : vector<8x96xf32>
    %367 = math.tanh %366 : vector<8x96xf32>
    %cst_101 = arith.constant 5.000000e-01 : f32
    %368 = vector.broadcast %cst_101 : f32 to vector<8x96xf32>
    %369 = arith.mulf %368, %367 : vector<8x96xf32>
    %cst_102 = arith.constant 5.000000e-01 : f32
    %370 = vector.broadcast %cst_102 : f32 to vector<8x96xf32>
    %371 = arith.addf %369, %370 : vector<8x96xf32>
    %372 = vector.extract_strided_slice %363 {offsets = [0, 96], sizes = [8, 32], strides = [1, 1]} : vector<8x128xf32> to vector<8x32xf32>
    %373 = math.tanh %372 : vector<8x32xf32>
    %374 = vector.extract_strided_slice %371 {offsets = [0, 0], sizes = [8, 32], strides = [1, 1]} : vector<8x96xf32> to vector<8x32xf32>
    %375 = vector.extract_strided_slice %371 {offsets = [0, 32], sizes = [8, 32], strides = [1, 1]} : vector<8x96xf32> to vector<8x32xf32>
    %376 = vector.extract_strided_slice %371 {offsets = [0, 64], sizes = [8, 32], strides = [1, 1]} : vector<8x96xf32> to vector<8x32xf32>
    %377 = arith.mulf %375, %333 : vector<8x32xf32>
    %378 = arith.mulf %374, %373 : vector<8x32xf32>
    %379 = arith.addf %377, %378 : vector<8x32xf32>
    %380 = math.tanh %379 : vector<8x32xf32>
    %381 = arith.mulf %376, %380 : vector<8x32xf32>
    %c8_i32_103 = arith.constant 8 : i32
    %c0_104 = arith.constant 0 : index
    %c0_105 = arith.constant 0 : index
    %382 = vector.load %arg7[%c0_104, %c0_105] : memref<32x1xf32, #tpu.memory_space<vmem>>, vector<32x1xf32>
    %cst_106 = arith.constant dense<0.000000e+00> : vector<8x1xf32>
    %383 = tpu.matmul %381, %382, %cst_106 {dimension_numbers = #tpu.dot_dimension_numbers<[1], [0], [0], [1], [0, 0, 1, 1], [], []>} : vector<8x32xf32>, vector<32x1xf32>, vector<8x1xf32> -> vector<8x1xf32>
    %c0_107 = arith.constant 0 : index
    %c0_108 = arith.constant 0 : index
    %384 = vector.load %arg8[%c0_107, %c0_108] : memref<1x1xf32, #tpu.memory_space<vmem>>, vector<1x1xf32>
    %385 = vector.broadcast %384 : vector<1x1xf32> to vector<8x1xf32>
    %386 = arith.addf %383, %385 : vector<8x1xf32>
    %c0_109 = arith.constant 0 : index
    %c0_110 = arith.constant 0 : index
    %387 = vector.load %arg9[%c0_109, %c0_110] : memref<8x1xf32, #tpu.memory_space<vmem>>, vector<8x1xf32>
    tpu.vector_store %arg9[%c0_109, %c0_110], %386 {strides = array<i32>} : memref<8x1xf32, #tpu.memory_space<vmem>>, vector<8x1xf32>,
    return
  }
}

</mosaic_0001>

<bundles_post_ra>
// kernel: tpu_custom_call.1
= control target key start
LH: loop header
LB: loop body
LE: loop exit
PB: predicated region body
PF: predicated region fallthrough
CT: control target
= control target key end

     0   :  { %vm94_vm0 = vcmask 1043456   ;;  %vm69_vm1 = vcmask 31744   ;;  %v3017_v0 = vmov 0.0   ;;  %vm3018_vm2 = vmmov 0   ;;  %s3019_s24 = smov 32   ;;  %s3020_s10 = smov 64   ;;  %s3661_s1 = inlined_call_operand.vmem [shape: f32[4,128], index: 1, kind: input, shape index: {}]   ;;  %s3662_s2 = inlined_call_operand.vmem [shape: f32[32,128], index: 2, kind: input, shape index: {}]   ;;  %s3663_s0 = inlined_call_operand.vmem [shape: f32[64,4], index: 0, kind: input, shape index: {}]   ;;  %s3664_s3 = inlined_call_operand.vmem [shape: f32[1,128], index: 3, kind: input, shape index: {}]   ;;  %s3665_s4 = inlined_call_operand.vmem [shape: f32[32,128], index: 4, kind: input, shape index: {}]   ;;  %s3666_s5 = inlined_call_operand.vmem [shape: f32[32,128], index: 5, kind: input, shape index: {}]   ;;  %s3667_s6 = inlined_call_operand.vmem [shape: f32[1,128], index: 6, kind: input, shape index: {}]   ;;  %s3668_s7 = inlined_call_operand.vmem [shape: f32[32,1], index: 7, kind: input, shape index: {}]   ;;  %s3669_s8 = inlined_call_operand.<no memory space> [shape: f32[1,1], index: 8, kind: input, shape index: {}]   ;;  %s3670_s9 = inlined_call_operand.vmem [shape: f32[8,1], index: 9, kind: output, shape index: {}]  }
   0x1   :  { %2628 = vmatprep.subr.mxu1 %v3017_v0  ;;  %v34_v1 = vld [vmem:[%s3661_s1] sm:$0xf]  ;;  %v3078_v2 = vld [vmem:[%s3662_s2 + $0x18] sm:$0xff]  ;;  %2636 = vmatprep.mubr.msk.f32.mxu1 %vm3018_vm2, %v3017_v0  ;;  %v56_v4 = vld [vmem:[%s3663_s0 + $0x8] sm:$0xff]  ;;  %vm212_vm3 = vcmask 261120   ;;  %vm2439_vm4 = vcmask 7168  }
   0x2   :  { %v55_v3 = vld [vmem:[%s3663_s0] sm:$0xff]  ;;  %2614 = vmatprep.subr.msk.mxu0 %vm94_vm0, %v34_v1  ;;  %2629 = vmatpush3.msra.mxu1 %v3078_v2  ;;  %v3092_v5 = vld [vmem:[%s3662_s2 + $0x10] sm:$0xff]  ;;  %v3100_v6 = vld [vmem:[%s3662_s2 + $0x8] sm:$0xff] }
   0x3   :  { %2615 = vmatpush3.msk.msra.mxu0 %vm94_vm0, %v34_v1  ;;  %2616 = vmatprep.mubr.msk.f32.mxu0 %vm69_vm1, %v55_v3  ;;  %v3108_v7 = vld [vmem:[%s3662_s2] sm:$0xff]  ;;  %v57_v25 = vld [vmem:[%s3663_s0 + $0x10] sm:$0xff]  ;;  %v58_v26 = vld [vmem:[%s3663_s0 + $0x18] sm:$0xff] }
   0x4   :  { %2630 = vmatprep.subr.mxu1 %v3017_v0  ;;  %2617 = vmatmul.mubr.msk.f32.vlgmr.msra.gmra.mxu0 %vm69_vm1, %v56_v4  ;;  %v3122_v9 = vld [vmem:[%s3664_s3] ss:$0 sm:$0xff]  ;;  %v3143_v28 = vld [vmem:[%s3665_s4 + $0x18] sm:$0xff]  ;;  %v3148_v29 = vld [vmem:[%s3665_s4 + $0x10] sm:$0xff] }
   0x5   :  { %2631 = vmatpush3.msra.mxu1 %v3092_v5  ;;  %2650 = vmatprep.subr.mxu0 %v3017_v0  ;;  %v59_v27 = vld [vmem:[%s3663_s0 + $0x20] sm:$0xff]  ;;  %v3155_v30 = vld [vmem:[%s3666_s5 + $0x18] sm:$0xff]  ;;  %v60_v31 = vld [vmem:[%s3663_s0 + $0x28] sm:$0xff] }
   0x6   :  { %2632 = vmatprep.subr.mxu1 %v3017_v0  ;;  %2619 = vmatprep.mubr.msk.f32.mxu0 %vm69_vm1, %v57_v25  ;;  %v3165_v32 = vld [vmem:[%s3665_s4 + $0x8] sm:$0xff]  ;;  %v61_v33 = vld [vmem:[%s3663_s0 + $0x30] sm:$0xff]  ;;  %v3182_v35 = vld [vmem:[%s3665_s4] sm:$0xff] }
   0x7   :  { %2633 = vmatpush3.msra.mxu1 %v3100_v6  ;;  %2651 = vmatpush3.msra.mxu0 %v3155_v30  ;;  %v3177_v34 = vld [vmem:[%s3666_s5 + $0x10] sm:$0xff]  ;;  %v62_v36 = vld [vmem:[%s3663_s0 + $0x38] sm:$0xff]  ;;  %v3196_v37 = vld [vmem:[%s3666_s5 + $0x8] sm:$0xff] }
   0x8   :  { %2634 = vmatprep.subr.mxu1 %v3017_v0  ;;  %2620 = vmatmul.mubr.msk.f32.gmra.mxu0 %vm69_vm1, %v58_v26  ;;  %v3209_v39 = vld [vmem:[%s3666_s5] sm:$0xff] }
   0x9   :  { %2635 = vmatpush3.msra.mxu1 %v3108_v7  ;;  %2622 = vmatprep.mubr.msk.f32.mxu0 %vm69_vm1, %v59_v27  ;;  %v3262_v51 = vld [vmem:[%s3667_s6] ss:$0 sm:$0xff] }
   0xa   :  { %2637 = vmatmul.mubr.f32.vlgmr.msra.gmra.mxu1 %v3017_v0  ;;  %2639 = vmatprep.subr.mxu1 %v3017_v0 }
   0xb   :  { %2647 = vmatprep.mubr.msk.f32.mxu1 %vm3018_vm2, %v3017_v0  ;;  %2640 = vmatpush3.msra.mxu1 %v3143_v28 }
   0xc   :  { %2641 = vmatprep.subr.mxu1 %v3017_v0  ;;  %2652 = vmatprep.subr.mxu0 %v3017_v0 }
   0xd   :  { %2642 = vmatpush3.msra.mxu1 %v3148_v29  ;;  %2623 = vmatmul.mubr.msk.f32.gmra.mxu0 %vm69_vm1, %v60_v31 }
   0xe   :  { %2643 = vmatprep.subr.mxu1 %v3017_v0  ;;  %2625 = vmatprep.mubr.msk.f32.mxu0 %vm69_vm1, %v61_v33 }
   0xf   :  { %2644 = vmatpush3.msra.mxu1 %v3165_v32  ;;  %2653 = vmatpush3.msra.mxu0 %v3177_v34 }
  0x10   :  { %2645 = vmatprep.subr.mxu1 %v3017_v0  ;;  %2654 = vmatprep.subr.mxu0 %v3017_v0 }
  0x11   :  { %2646 = vmatpush3.msra.mxu1 %v3182_v35  ;;  %2626 = vmatmul.mubr.msk.f32.gmra.mxu0 %vm69_vm1, %v62_v36 }
  0x12   :  { %2661 = vmatprep.subr.mxu1 %v3017_v0  ;;  %2655 = vmatpush3.msra.mxu0 %v3196_v37 }
  0x13   :  { %2656 = vmatprep.subr.mxu0 %v3017_v0  ;;  %2658 = vmatprep.mubr.msk.f32.mxu0 %vm3018_vm2, %v3017_v0 }
  0x14   :  { %2657 = vmatpush3.msra.mxu0 %v3209_v39 }
  0x15   :  { %2659 = vmatmul.mubr.f32.vlgmr.msra.gmra.mxu0 %v3017_v0  ;;  %2672 = vmatprep.subr.mxu0 %v3017_v0 }
  0x16   :  { %2673 = vmatpush3.msra.mxu0 %v3143_v28  ;;  %2680 = vmatprep.mubr.msk.f32.mxu0 %vm3018_vm2, %v3017_v0 }
  0x17   :  { %2674 = vmatprep.subr.mxu0 %v3017_v0 }
  0x18   :  { %2675 = vmatpush3.msra.mxu0 %v3148_v29 }
  0x19   :  { %2676 = vmatprep.subr.mxu0 %v3017_v0 }
  0x1a   :  { %2677 = vmatpush3.msra.mxu0 %v3165_v32 }
  0x1b   :  { %2678 = vmatprep.subr.mxu0 %v3017_v0 }
  0x1c   :  { %2679 = vmatpush3.msra.mxu0 %v3182_v35 }
  0x1d   :  { %2694 = vmatprep.subr.mxu0 %v3017_v0 }
  0xc4   :  { %v3117_v8 = vpop.f32.mrf.mxu0 }
  0xc5   :  { %v170_v56 = vadd.f32 %v3117_v8, %v3122_v9 }
  0xc6   :  { %v164_v10 = vpop.f32.mrf.mxu0 }
  0xc7   :  { %v165_v11 = vadd.f32 %v3122_v9, %v164_v10 }
  0xc8   :  { %v3247_v43 = vpop.f32.mrf.mxu0 }
  0xca   :  { %v282_v12 = vpop.f32.mrf.mxu1  ;;  %v3249_v44 = vpop.f32.mrf.mxu0 }
  0xcb   :  { %v286_v13 = vadd.f32 %v282_v12, %v165_v11 }
  0xcc   :  { %v2638_v14 = vpop.f32.mrf.mxu1 }
  0xcd   :  { %2907 = vtanh.f32 %v286_v13  ;;  %v287_v16 = vmul.f32 0.5, %v286_v13  ;;  %v3251_v45 = vpop.f32.mrf.mxu0 }
  0xcf   :  { %2909 = vtanh.f32 %v287_v16  ;;  %v3253_v46 = vpop.f32.mrf.mxu0 }
  0xd1   :  { %v3255_v47 = vpop.f32.mrf.mxu0 }
  0xd3   :  { %v3257_v48 = vpop.f32.mrf.mxu0 }
  0xd5   :  { %v450_v49 = vpop.f32.mrf.mxu0 }
  0xd7   :  { %v2660_v50 = vpop.f32.mrf.mxu0 }
  0xd8   :  { %v175_v50 = vadd.f32 %v3122_v9, %v3249_v44 }
  0xda   :  { %v2908_v15 = vpop.eup %2907 }
  0xdb   :  { %294 = vrot.lane.b32.xlu0 %v2908_v15, %s3019_s24 }
  0xdc   :  { %v2910_v17 = vpop.eup %2909 }
  0xdd   :  { %v289_v18 = vmul.f32 0.5, %v2910_v17 }
  0xdf   :  { %v290_v19 = vadd.f32 0.5, %v289_v18 }
  0xe1   :  { %v292_v22 = vmul.f32 0.0, %v290_v19 }
 0x14d   :  { %v295_v20 = vpop.permute.xlu0 %294 }
 0x14e   :  { %v297_v21 = vmul.f32 %v295_v20, %v290_v19 }
 0x150   :  { %299 = vrot.lane.b32.xlu0 %v297_v21, %s3019_s24 }
 0x1c2   :  { %v300_v23 = vpop.permute.xlu0 %299 }
 0x1c3   :  { %v3127_v24 = vadd.f32 %v300_v23, %v292_v22 }
 0x1c5   :  { %2911 = vtanh.f32 %v3127_v24 }
 0x1d2   :  { %v2912_v38 = vpop.eup %2911 }
 0x1d3   :  { %305 = vrot.lane.b32.xlu1 %v2912_v38, %s3019_s24 }
 0x245   :  { %v306_v40 = vpop.permute.xlu1 %305 }
 0x246   :  { %v308_v41 = vmul.f32 %v306_v40, %v290_v19 }
 0x248   :  { %310 = vrot.lane.b32.xlu1 %v308_v41, %s3020_s10 }
 0x2ba   :  { %v311_v42 = vpop.permute.xlu1 %310 }
 0x2bb   :  { %2648 = vmatmul.mubr.msk.f32.vlgmr.msra.gmra.mxu1 %vm212_vm3, %v311_v42 }
 0x2bc   :  { %2662 = vmatpush3.msra.mxu1 %v3078_v2  ;;  %2669 = vmatprep.mubr.msk.f32.mxu1 %vm3018_vm2, %v3017_v0 }
 0x2bd   :  { %2663 = vmatprep.subr.mxu1 %v3017_v0 }
 0x2be   :  { %2664 = vmatpush3.msra.mxu1 %v3092_v5 }
 0x2bf   :  { %2665 = vmatprep.subr.mxu1 %v3017_v0 }
 0x2c0   :  { %2666 = vmatpush3.msra.mxu1 %v3100_v6 }
 0x2c1   :  { %2667 = vmatprep.subr.mxu1 %v3017_v0 }
 0x2c2   :  { %2668 = vmatpush3.msra.mxu1 %v3108_v7 }
 0x2c3   :  { %2670 = vmatmul.mubr.msk.f32.vlgmr.msra.gmra.mxu1 %vm212_vm3, %v311_v42  ;;  %2683 = vmatprep.subr.mxu1 %v3017_v0 }
 0x2c4   :  { %2684 = vmatpush3.msra.mxu1 %v3155_v30  ;;  %2691 = vmatprep.mubr.msk.f32.mxu1 %vm3018_vm2, %v3017_v0 }
 0x2c5   :  { %2685 = vmatprep.subr.mxu1 %v3017_v0 }
 0x2c6   :  { %2686 = vmatpush3.msra.mxu1 %v3177_v34 }
 0x2c7   :  { %2687 = vmatprep.subr.mxu1 %v3017_v0 }
 0x2c8   :  { %2688 = vmatpush3.msra.mxu1 %v3196_v37 }
 0x2c9   :  { %2689 = vmatprep.subr.mxu1 %v3017_v0 }
 0x2ca   :  { %2690 = vmatpush3.msra.mxu1 %v3209_v39 }
 0x2cb   :  { %2705 = vmatprep.subr.mxu1 %v3017_v0 }
 0x37b   :  { %v380_v52 = vpop.f32.mrf.mxu1 }
 0x37c   :  { %v381_v53 = vadd.f32 %v3262_v51, %v380_v52 }
 0x37d   :  { %v2649_v54 = vpop.f32.mrf.mxu1 }
 0x37e   :  { %v454_v55 = vadd.f32 %v450_v49, %v381_v53 }
 0x380   :  { %2913 = vtanh.f32 %v454_v55  ;;  %v455_v62 = vmul.f32 0.5, %v454_v55 }
 0x383   :  { %v545_v57 = vpop.f32.mrf.mxu1 }
 0x384   :  { %v549_v58 = vadd.f32 %v545_v57, %v170_v56 }
 0x385   :  { %v2671_v59 = vpop.f32.mrf.mxu1 }
 0x386   :  { %2915 = vtanh.f32 %v549_v58  ;;  %v550_v63 = vmul.f32 0.5, %v549_v58 }
 0x387   :  { %2917 = vtanh.f32 %v455_v62 }
 0x388   :  { %2919 = vtanh.f32 %v550_v63 }
 0x38d   :  { %v2914_v60 = vpop.eup %2913 }
 0x38e   :  { %462 = vrot.lane.b32.xlu1 %v2914_v60, %s3019_s24 }
 0x393   :  { %v2916_v61 = vpop.eup %2915 }
 0x394   :  { %557 = vrot.lane.b32.xlu0 %v2916_v61, %s3019_s24  ;;  %v2918_v1 = vpop.eup %2917 }
 0x395   :  { %v457_v3 = vmul.f32 0.5, %v2918_v1  ;;  %v2920_v4 = vpop.eup %2919 }
 0x396   :  { %v552_v12 = vmul.f32 0.5, %v2920_v4 }
 0x397   :  { %v458_v10 = vadd.f32 0.5, %v457_v3 }
 0x398   :  { %v553_v13 = vadd.f32 0.5, %v552_v12 }
 0x399   :  { %v460_v16 = vmul.f32 0.0, %v458_v10 }
 0x39a   :  { %v555_v19 = vmul.f32 %v553_v13, %v3127_v24 }
 0x400   :  { %v463_v11 = vpop.permute.xlu1 %462 }
 0x401   :  { %v465_v8 = vmul.f32 %v463_v11, %v458_v10 }
 0x403   :  { %467 = vrot.lane.b32.xlu1 %v465_v8, %s3019_s24 }
 0x406   :  { %v558_v14 = vpop.permute.xlu0 %557 }
 0x407   :  { %v560_v15 = vmul.f32 %v558_v14, %v553_v13 }
 0x409   :  { %562 = vrot.lane.b32.xlu0 %v560_v15, %s3019_s24 }
 0x475   :  { %v468_v17 = vpop.permute.xlu1 %467 }
 0x476   :  { %v3271_v18 = vadd.f32 %v468_v17, %v460_v16 }
 0x478   :  { %2921 = vtanh.f32 %v3271_v18 }
 0x47b   :  { %v563_v20 = vpop.permute.xlu0 %562 }
 0x47c   :  { %v3275_v21 = vadd.f32 %v563_v20, %v555_v19 }
 0x47e   :  { %2923 = vtanh.f32 %v3275_v21 }
 0x485   :  { %v2922_v22 = vpop.eup %2921 }
 0x486   :  { %473 = vrot.lane.b32.xlu1 %v2922_v22, %s3019_s24 }
 0x48b   :  { %v2924_v23 = vpop.eup %2923 }
 0x48c   :  { %568 = vrot.lane.b32.xlu0 %v2924_v23, %s3019_s24 }
 0x4f8   :  { %v474_v25 = vpop.permute.xlu1 %473 }
 0x4f9   :  { %v476_v26 = vmul.f32 %v474_v25, %v458_v10 }
 0x4fb   :  { %648 = vrot.lane.b32.xlu1 %v476_v26, %s3020_s10 }
 0x4fe   :  { %v569_v27 = vpop.permute.xlu0 %568 }
 0x4ff   :  { %v571_v31 = vmul.f32 %v569_v27, %v553_v13 }
 0x501   :  { %573 = vrot.lane.b32.xlu0 %v571_v31, %s3020_s10 }
 0x56d   :  { %v649_v24 = vpop.permute.xlu1 %648 }
 0x56e   :  { %2692 = vmatmul.mubr.msk.f32.vlgmr.msra.gmra.mxu1 %vm212_vm3, %v649_v24 }
 0x56f   :  { %2706 = vmatpush3.msra.mxu1 %v3143_v28  ;;  %2713 = vmatprep.mubr.msk.f32.mxu1 %vm3018_vm2, %v3017_v0 }
 0x570   :  { %2707 = vmatprep.subr.mxu1 %v3017_v0 }
 0x571   :  { %2708 = vmatpush3.msra.mxu1 %v3148_v29 }
 0x572   :  { %2709 = vmatprep.subr.mxu1 %v3017_v0 }
 0x573   :  { %v574_v33 = vpop.permute.xlu0 %573  ;;  %2710 = vmatpush3.msra.mxu1 %v3165_v32 }
 0x574   :  { %2681 = vmatmul.mubr.msk.f32.vlgmr.msra.gmra.mxu0 %vm212_vm3, %v574_v33  ;;  %2711 = vmatprep.subr.mxu1 %v3017_v0 }
 0x575   :  { %2695 = vmatpush3.msra.mxu0 %v3078_v2  ;;  %2702 = vmatprep.mubr.msk.f32.mxu0 %vm3018_vm2, %v3017_v0 }
 0x576   :  { %2696 = vmatprep.subr.mxu0 %v3017_v0  ;;  %2712 = vmatpush3.msra.mxu1 %v3182_v35 }
 0x577   :  { %2697 = vmatpush3.msra.mxu0 %v3092_v5  ;;  %2727 = vmatprep.subr.mxu1 %v3017_v0 }
 0x578   :  { %2698 = vmatprep.subr.mxu0 %v3017_v0 }
 0x579   :  { %2699 = vmatpush3.msra.mxu0 %v3100_v6 }
 0x57a   :  { %2700 = vmatprep.subr.mxu0 %v3017_v0 }
 0x57b   :  { %2701 = vmatpush3.msra.mxu0 %v3108_v7 }
 0x57c   :  { %2703 = vmatmul.mubr.msk.f32.vlgmr.msra.gmra.mxu0 %vm212_vm3, %v574_v33  ;;  %2716 = vmatprep.subr.mxu0 %v3017_v0 }
 0x57d   :  { %2717 = vmatpush3.msra.mxu0 %v3155_v30  ;;  %2724 = vmatprep.mubr.msk.f32.mxu0 %vm3018_vm2, %v3017_v0 }
 0x57e   :  { %2718 = vmatprep.subr.mxu0 %v3017_v0 }
 0x57f   :  { %2719 = vmatpush3.msra.mxu0 %v3177_v34 }
 0x580   :  { %2720 = vmatprep.subr.mxu0 %v3017_v0 }
 0x581   :  { %2721 = vmatpush3.msra.mxu0 %v3196_v37 }
 0x582   :  { %2722 = vmatprep.subr.mxu0 %v3017_v0 }
 0x583   :  { %2723 = vmatpush3.msra.mxu0 %v3209_v39 }
 0x584   :  { %2738 = vmatprep.subr.mxu0 %v3017_v0 }
 0x62e   :  { %v718_v36 = vpop.f32.mrf.mxu1 }
 0x630   :  { %v2693_v38 = vpop.f32.mrf.mxu1 }
 0x634   :  { %v643_v40 = vpop.f32.mrf.mxu0 }
 0x635   :  { %v644_v41 = vadd.f32 %v3262_v51, %v643_v40 }
 0x636   :  { %v2682_v42 = vpop.f32.mrf.mxu0 }
 0x637   :  { %v722_v49 = vadd.f32 %v718_v36, %v644_v41  ;;  %v180_v36 = vadd.f32 %v3247_v43, %v3122_v9 }
 0x639   :  { %2925 = vtanh.f32 %v722_v49  ;;  %v723_v57 = vmul.f32 0.5, %v722_v49 }
 0x63c   :  { %v813_v52 = vpop.f32.mrf.mxu0 }
 0x63d   :  { %v817_v53 = vadd.f32 %v813_v52, %v175_v50 }
 0x63e   :  { %v2704_v54 = vpop.f32.mrf.mxu0 }
 0x63f   :  { %2927 = vtanh.f32 %v817_v53  ;;  %v818_v58 = vmul.f32 0.5, %v817_v53 }
 0x640   :  { %2929 = vtanh.f32 %v723_v57 }
 0x641   :  { %2931 = vtanh.f32 %v818_v58 }
 0x646   :  { %v2926_v55 = vpop.eup %2925 }
 0x647   :  { %730 = vrot.lane.b32.xlu1 %v2926_v55, %s3019_s24 }
 0x64c   :  { %v2928_v56 = vpop.eup %2927 }
 0x64d   :  { %825 = vrot.lane.b32.xlu0 %v2928_v56, %s3019_s24  ;;  %v2930_v59 = vpop.eup %2929 }
 0x64e   :  { %v725_v60 = vmul.f32 0.5, %v2930_v59  ;;  %v2932_v61 = vpop.eup %2931 }
 0x64f   :  { %v820_v1 = vmul.f32 0.5, %v2932_v61 }
 0x650   :  { %v726_v62 = vadd.f32 0.5, %v725_v60 }
 0x651   :  { %v821_v3 = vadd.f32 0.5, %v820_v1 }
 0x652   :  { %v728_v11 = vmul.f32 %v726_v62, %v3271_v18 }
 0x653   :  { %v823_v13 = vmul.f32 %v821_v3, %v3275_v21 }
 0x6b9   :  { %v731_v63 = vpop.permute.xlu1 %730 }
 0x6ba   :  { %v733_v44 = vmul.f32 %v731_v63, %v726_v62 }
 0x6bc   :  { %735 = vrot.lane.b32.xlu1 %v733_v44, %s3019_s24 }
 0x6bf   :  { %v826_v4 = vpop.permute.xlu0 %825 }
 0x6c0   :  { %v828_v10 = vmul.f32 %v826_v4, %v821_v3 }
 0x6c2   :  { %830 = vrot.lane.b32.xlu0 %v828_v10, %s3019_s24 }
 0x72e   :  { %v736_v8 = vpop.permute.xlu1 %735 }
 0x72f   :  { %v3323_v12 = vadd.f32 %v736_v8, %v728_v11 }
 0x731   :  { %2933 = vtanh.f32 %v3323_v12 }
 0x734   :  { %v831_v14 = vpop.permute.xlu0 %830 }
 0x735   :  { %v3327_v15 = vadd.f32 %v831_v14, %v823_v13 }
 0x737   :  { %2935 = vtanh.f32 %v3327_v15 }
 0x73e   :  { %v2934_v16 = vpop.eup %2933 }
 0x73f   :  { %741 = vrot.lane.b32.xlu1 %v2934_v16, %s3019_s24 }
 0x744   :  { %v2936_v17 = vpop.eup %2935 }
 0x745   :  { %836 = vrot.lane.b32.xlu0 %v2936_v17, %s3019_s24 }
 0x7b1   :  { %v742_v19 = vpop.permute.xlu1 %741 }
 0x7b2   :  { %v744_v18 = vmul.f32 %v742_v19, %v726_v62 }
 0x7b4   :  { %916 = vrot.lane.b32.xlu1 %v744_v18, %s3020_s10 }
 0x7b7   :  { %v837_v20 = vpop.permute.xlu0 %836 }
 0x7b8   :  { %v839_v22 = vmul.f32 %v837_v20, %v821_v3 }
 0x7ba   :  { %841 = vrot.lane.b32.xlu0 %v839_v22, %s3020_s10 }
 0x826   :  { %v917_v21 = vpop.permute.xlu1 %916 }
 0x827   :  { %2725 = vmatmul.mubr.msk.f32.vlgmr.msra.gmra.mxu0 %vm212_vm3, %v917_v21 }
 0x828   :  { %2739 = vmatpush3.msra.mxu0 %v3143_v28  ;;  %2746 = vmatprep.mubr.msk.f32.mxu0 %vm3018_vm2, %v3017_v0 }
 0x829   :  { %2740 = vmatprep.subr.mxu0 %v3017_v0 }
 0x82a   :  { %2741 = vmatpush3.msra.mxu0 %v3148_v29 }
 0x82b   :  { %2742 = vmatprep.subr.mxu0 %v3017_v0 }
 0x82c   :  { %v842_v23 = vpop.permute.xlu0 %841  ;;  %2743 = vmatpush3.msra.mxu0 %v3165_v32 }
 0x82d   :  { %2714 = vmatmul.mubr.msk.f32.vlgmr.msra.gmra.mxu1 %vm212_vm3, %v842_v23  ;;  %2744 = vmatprep.subr.mxu0 %v3017_v0 }
 0x82e   :  { %2728 = vmatpush3.msra.mxu1 %v3078_v2  ;;  %2735 = vmatprep.mubr.msk.f32.mxu1 %vm3018_vm2, %v3017_v0 }
 0x82f   :  { %2729 = vmatprep.subr.mxu1 %v3017_v0  ;;  %2745 = vmatpush3.msra.mxu0 %v3182_v35 }
 0x830   :  { %2730 = vmatpush3.msra.mxu1 %v3092_v5  ;;  %2760 = vmatprep.subr.mxu0 %v3017_v0 }
 0x831   :  { %2731 = vmatprep.subr.mxu1 %v3017_v0 }
 0x832   :  { %2732 = vmatpush3.msra.mxu1 %v3100_v6 }
 0x833   :  { %2733 = vmatprep.subr.mxu1 %v3017_v0 }
 0x834   :  { %2734 = vmatpush3.msra.mxu1 %v3108_v7 }
 0x835   :  { %2736 = vmatmul.mubr.msk.f32.vlgmr.msra.gmra.mxu1 %vm212_vm3, %v842_v23  ;;  %2749 = vmatprep.subr.mxu1 %v3017_v0  ;;  %v185_v23 = vadd.f32 %v3122_v9, %v3253_v46 }
 0x836   :  { %2750 = vmatpush3.msra.mxu1 %v3155_v30  ;;  %2757 = vmatprep.mubr.msk.f32.mxu1 %vm3018_vm2, %v3017_v0 }
 0x837   :  { %2751 = vmatprep.subr.mxu1 %v3017_v0 }
 0x838   :  { %2752 = vmatpush3.msra.mxu1 %v3177_v34 }
 0x839   :  { %2753 = vmatprep.subr.mxu1 %v3017_v0 }
 0x83a   :  { %2754 = vmatpush3.msra.mxu1 %v3196_v37 }
 0x83b   :  { %2755 = vmatprep.subr.mxu1 %v3017_v0 }
 0x83c   :  { %2756 = vmatpush3.msra.mxu1 %v3209_v39 }
 0x83d   :  { %2771 = vmatprep.subr.mxu1 %v3017_v0 }
 0x8e7   :  { %v986_v25 = vpop.f32.mrf.mxu0 }
 0x8e9   :  { %v2726_v26 = vpop.f32.mrf.mxu0 }
 0x8ed   :  { %v911_v27 = vpop.f32.mrf.mxu1 }
 0x8ee   :  { %v912_v31 = vadd.f32 %v3262_v51, %v911_v27 }
 0x8ef   :  { %v2715_v24 = vpop.f32.mrf.mxu1 }
 0x8f0   :  { %v990_v33 = vadd.f32 %v986_v25, %v912_v31 }
 0x8f2   :  { %2937 = vtanh.f32 %v990_v33  ;;  %v991_v50 = vmul.f32 0.5, %v990_v33 }
 0x8f5   :  { %v1081_v38 = vpop.f32.mrf.mxu1 }
 0x8f6   :  { %v1085_v40 = vadd.f32 %v1081_v38, %v180_v36 }
 0x8f7   :  { %v2737_v41 = vpop.f32.mrf.mxu1 }
 0x8f8   :  { %2939 = vtanh.f32 %v1085_v40  ;;  %v1086_v52 = vmul.f32 0.5, %v1085_v40 }
 0x8f9   :  { %2941 = vtanh.f32 %v991_v50 }
 0x8fa   :  { %2943 = vtanh.f32 %v1086_v52 }
 0x8ff   :  { %v2938_v42 = vpop.eup %2937 }
 0x900   :  { %998 = vrot.lane.b32.xlu1 %v2938_v42, %s3019_s24 }
 0x905   :  { %v2940_v49 = vpop.eup %2939 }
 0x906   :  { %1093 = vrot.lane.b32.xlu0 %v2940_v49, %s3019_s24  ;;  %v2942_v53 = vpop.eup %2941 }
 0x907   :  { %v993_v54 = vmul.f32 0.5, %v2942_v53  ;;  %v2944_v55 = vpop.eup %2943 }
 0x908   :  { %v1088_v58 = vmul.f32 0.5, %v2944_v55 }
 0x909   :  { %v994_v56 = vadd.f32 0.5, %v993_v54 }
 0x90a   :  { %v1089_v59 = vadd.f32 0.5, %v1088_v58 }
 0x90b   :  { %v996_v62 = vmul.f32 %v994_v56, %v3323_v12 }
 0x90c   :  { %v1091_v1 = vmul.f32 %v1089_v59, %v3327_v15 }
 0x972   :  { %v999_v57 = vpop.permute.xlu1 %998 }
 0x973   :  { %v1001_v43 = vmul.f32 %v999_v57, %v994_v56 }
 0x975   :  { %1003 = vrot.lane.b32.xlu1 %v1001_v43, %s3019_s24 }
 0x978   :  { %v1094_v60 = vpop.permute.xlu0 %1093 }
 0x979   :  { %v1096_v61 = vmul.f32 %v1094_v60, %v1089_v59 }
 0x97b   :  { %1098 = vrot.lane.b32.xlu0 %v1096_v61, %s3019_s24 }
 0x9e7   :  { %v1004_v63 = vpop.permute.xlu1 %1003 }
 0x9e8   :  { %v3375_v44 = vadd.f32 %v1004_v63, %v996_v62 }
 0x9ea   :  { %2945 = vtanh.f32 %v3375_v44 }
 0x9ed   :  { %v1099_v3 = vpop.permute.xlu0 %1098 }
 0x9ee   :  { %v3379_v4 = vadd.f32 %v1099_v3, %v1091_v1 }
 0x9f0   :  { %2947 = vtanh.f32 %v3379_v4 }
 0x9f7   :  { %v2946_v10 = vpop.eup %2945 }
 0x9f8   :  { %1009 = vrot.lane.b32.xlu1 %v2946_v10, %s3019_s24 }
 0x9fd   :  { %v2948_v11 = vpop.eup %2947 }
 0x9fe   :  { %1104 = vrot.lane.b32.xlu0 %v2948_v11, %s3019_s24 }
 0xa6a   :  { %v1010_v8 = vpop.permute.xlu1 %1009 }
 0xa6b   :  { %v1012_v12 = vmul.f32 %v1010_v8, %v994_v56  ;;  %v190_v8 = vadd.f32 %v3251_v45, %v3122_v9 }
 0xa6d   :  { %1184 = vrot.lane.b32.xlu1 %v1012_v12, %s3020_s10 }
 0xa70   :  { %v1105_v13 = vpop.permute.xlu0 %1104 }
 0xa71   :  { %v1107_v14 = vmul.f32 %v1105_v13, %v1089_v59 }
 0xa73   :  { %1109 = vrot.lane.b32.xlu0 %v1107_v14, %s3020_s10 }
 0xadf   :  { %v1185_v15 = vpop.permute.xlu1 %1184 }
 0xae0   :  { %2758 = vmatmul.mubr.msk.f32.vlgmr.msra.gmra.mxu1 %vm212_vm3, %v1185_v15 }
 0xae1   :  { %2772 = vmatpush3.msra.mxu1 %v3143_v28  ;;  %2779 = vmatprep.mubr.msk.f32.mxu1 %vm3018_vm2, %v3017_v0 }
 0xae2   :  { %2773 = vmatprep.subr.mxu1 %v3017_v0 }
 0xae3   :  { %2774 = vmatpush3.msra.mxu1 %v3148_v29 }
 0xae4   :  { %2775 = vmatprep.subr.mxu1 %v3017_v0 }
 0xae5   :  { %v1110_v16 = vpop.permute.xlu0 %1109  ;;  %2776 = vmatpush3.msra.mxu1 %v3165_v32 }
 0xae6   :  { %2747 = vmatmul.mubr.msk.f32.vlgmr.msra.gmra.mxu0 %vm212_vm3, %v1110_v16  ;;  %2777 = vmatprep.subr.mxu1 %v3017_v0 }
 0xae7   :  { %2761 = vmatpush3.msra.mxu0 %v3078_v2  ;;  %2768 = vmatprep.mubr.msk.f32.mxu0 %vm3018_vm2, %v3017_v0 }
 0xae8   :  { %2762 = vmatprep.subr.mxu0 %v3017_v0  ;;  %2778 = vmatpush3.msra.mxu1 %v3182_v35 }
 0xae9   :  { %2763 = vmatpush3.msra.mxu0 %v3092_v5  ;;  %2793 = vmatprep.subr.mxu1 %v3017_v0 }
 0xaea   :  { %2764 = vmatprep.subr.mxu0 %v3017_v0 }
 0xaeb   :  { %2765 = vmatpush3.msra.mxu0 %v3100_v6 }
 0xaec   :  { %2766 = vmatprep.subr.mxu0 %v3017_v0 }
 0xaed   :  { %2767 = vmatpush3.msra.mxu0 %v3108_v7 }
 0xaee   :  { %2769 = vmatmul.mubr.msk.f32.vlgmr.msra.gmra.mxu0 %vm212_vm3, %v1110_v16  ;;  %2782 = vmatprep.subr.mxu0 %v3017_v0 }
 0xaef   :  { %2783 = vmatpush3.msra.mxu0 %v3155_v30  ;;  %2790 = vmatprep.mubr.msk.f32.mxu0 %vm3018_vm2, %v3017_v0 }
 0xaf0   :  { %2784 = vmatprep.subr.mxu0 %v3017_v0 }
 0xaf1   :  { %2785 = vmatpush3.msra.mxu0 %v3177_v34 }
 0xaf2   :  { %2786 = vmatprep.subr.mxu0 %v3017_v0 }
 0xaf3   :  { %2787 = vmatpush3.msra.mxu0 %v3196_v37 }
 0xaf4   :  { %2788 = vmatprep.subr.mxu0 %v3017_v0 }
 0xaf5   :  { %2789 = vmatpush3.msra.mxu0 %v3209_v39 }
 0xaf6   :  { %2804 = vmatprep.subr.mxu0 %v3017_v0 }
 0xba0   :  { %v1254_v17 = vpop.f32.mrf.mxu1 }
 0xba2   :  { %v2759_v19 = vpop.f32.mrf.mxu1 }
 0xba6   :  { %v1179_v18 = vpop.f32.mrf.mxu0 }
 0xba7   :  { %v1180_v20 = vadd.f32 %v3262_v51, %v1179_v18 }
 0xba8   :  { %v2748_v22 = vpop.f32.mrf.mxu0 }
 0xba9   :  { %v1258_v21 = vadd.f32 %v1254_v17, %v1180_v20 }
 0xbab   :  { %2949 = vtanh.f32 %v1258_v21  ;;  %v1259_v33 = vmul.f32 0.5, %v1258_v21 }
 0xbae   :  { %v1349_v25 = vpop.f32.mrf.mxu0 }
 0xbaf   :  { %v1353_v26 = vadd.f32 %v1349_v25, %v185_v23 }
 0xbb0   :  { %v2770_v27 = vpop.f32.mrf.mxu0 }
 0xbb1   :  { %2951 = vtanh.f32 %v1353_v26  ;;  %v1354_v36 = vmul.f32 0.5, %v1353_v26 }
 0xbb2   :  { %2953 = vtanh.f32 %v1259_v33 }
 0xbb3   :  { %2955 = vtanh.f32 %v1354_v36 }
 0xbb8   :  { %v2950_v31 = vpop.eup %2949 }
 0xbb9   :  { %1266 = vrot.lane.b32.xlu1 %v2950_v31, %s3019_s24 }
 0xbbe   :  { %v2952_v24 = vpop.eup %2951 }
 0xbbf   :  { %1361 = vrot.lane.b32.xlu0 %v2952_v24, %s3019_s24  ;;  %v2954_v38 = vpop.eup %2953 }
 0xbc0   :  { %v1261_v40 = vmul.f32 0.5, %v2954_v38  ;;  %v2956_v41 = vpop.eup %2955 }
 0xbc1   :  { %v1356_v50 = vmul.f32 0.5, %v2956_v41 }
 0xbc2   :  { %v1262_v42 = vadd.f32 0.5, %v1261_v40 }
 0xbc3   :  { %v1357_v52 = vadd.f32 0.5, %v1356_v50 }
 0xbc4   :  { %v1264_v55 = vmul.f32 %v1262_v42, %v3375_v44 }
 0xbc5   :  { %v1359_v43 = vmul.f32 %v1357_v52, %v3379_v4 }
 0xc2b   :  { %v1267_v49 = vpop.permute.xlu1 %1266 }
 0xc2c   :  { %v1269_v46 = vmul.f32 %v1267_v49, %v1262_v42 }
 0xc2e   :  { %1271 = vrot.lane.b32.xlu1 %v1269_v46, %s3019_s24 }
 0xc31   :  { %v1362_v53 = vpop.permute.xlu0 %1361 }
 0xc32   :  { %v1364_v54 = vmul.f32 %v1362_v53, %v1357_v52 }
 0xc34   :  { %1366 = vrot.lane.b32.xlu0 %v1364_v54, %s3019_s24 }
 0xca0   :  { %v1272_v56 = vpop.permute.xlu1 %1271 }
 0xca1   :  { %v3427_v57 = vadd.f32 %v1272_v56, %v1264_v55 }
 0xca3   :  { %2957 = vtanh.f32 %v3427_v57 }
 0xca6   :  { %v1367_v58 = vpop.permute.xlu0 %1366 }
 0xca7   :  { %v3431_v59 = vadd.f32 %v1367_v58, %v1359_v43 }
 0xca9   :  { %2959 = vtanh.f32 %v3431_v59 }
 0xcb0   :  { %v2958_v60 = vpop.eup %2957 }
 0xcb1   :  { %1277 = vrot.lane.b32.xlu1 %v2958_v60, %s3019_s24 }
 0xcb6   :  { %v2960_v61 = vpop.eup %2959 }
 0xcb7   :  { %1372 = vrot.lane.b32.xlu0 %v2960_v61, %s3019_s24 }
 0xd23   :  { %v1278_v62 = vpop.permute.xlu1 %1277 }
 0xd24   :  { %v1280_v63 = vmul.f32 %v1278_v62, %v1262_v42 }
 0xd26   :  { %1452 = vrot.lane.b32.xlu1 %v1280_v63, %s3020_s10 }
 0xd29   :  { %v1373_v44 = vpop.permute.xlu0 %1372 }
 0xd2a   :  { %v1375_v1 = vmul.f32 %v1373_v44, %v1357_v52 }
 0xd2c   :  { %1377 = vrot.lane.b32.xlu0 %v1375_v1, %s3020_s10 }
 0xd98   :  { %v1453_v3 = vpop.permute.xlu1 %1452 }
 0xd99   :  { %2791 = vmatmul.mubr.msk.f32.vlgmr.msra.gmra.mxu0 %vm212_vm3, %v1453_v3 }
 0xd9a   :  { %2805 = vmatpush3.msra.mxu0 %v3143_v28  ;;  %2812 = vmatprep.mubr.msk.f32.mxu0 %vm3018_vm2, %v3017_v0 }
 0xd9b   :  { %2806 = vmatprep.subr.mxu0 %v3017_v0 }
 0xd9c   :  { %2807 = vmatpush3.msra.mxu0 %v3148_v29 }
 0xd9d   :  { %2808 = vmatprep.subr.mxu0 %v3017_v0 }
 0xd9e   :  { %v1378_v4 = vpop.permute.xlu0 %1377  ;;  %2809 = vmatpush3.msra.mxu0 %v3165_v32 }
 0xd9f   :  { %2780 = vmatmul.mubr.msk.f32.vlgmr.msra.gmra.mxu1 %vm212_vm3, %v1378_v4  ;;  %2810 = vmatprep.subr.mxu0 %v3017_v0 }
 0xda0   :  { %2794 = vmatpush3.msra.mxu1 %v3078_v2  ;;  %2801 = vmatprep.mubr.msk.f32.mxu1 %vm3018_vm2, %v3017_v0 }
 0xda1   :  { %2795 = vmatprep.subr.mxu1 %v3017_v0  ;;  %2811 = vmatpush3.msra.mxu0 %v3182_v35 }
 0xda2   :  { %2796 = vmatpush3.msra.mxu1 %v3092_v5  ;;  %2826 = vmatprep.subr.mxu0 %v3017_v0 }
 0xda3   :  { %2797 = vmatprep.subr.mxu1 %v3017_v0 }
 0xda4   :  { %2798 = vmatpush3.msra.mxu1 %v3100_v6 }
 0xda5   :  { %2799 = vmatprep.subr.mxu1 %v3017_v0 }
 0xda6   :  { %2800 = vmatpush3.msra.mxu1 %v3108_v7 }
 0xda7   :  { %2802 = vmatmul.mubr.msk.f32.vlgmr.msra.gmra.mxu1 %vm212_vm3, %v1378_v4  ;;  %2815 = vmatprep.subr.mxu1 %v3017_v0 }
 0xda8   :  { %2816 = vmatpush3.msra.mxu1 %v3155_v30  ;;  %2823 = vmatprep.mubr.msk.f32.mxu1 %vm3018_vm2, %v3017_v0 }
 0xda9   :  { %2817 = vmatprep.subr.mxu1 %v3017_v0 }
 0xdaa   :  { %2818 = vmatpush3.msra.mxu1 %v3177_v34 }
 0xdab   :  { %2819 = vmatprep.subr.mxu1 %v3017_v0 }
 0xdac   :  { %2820 = vmatpush3.msra.mxu1 %v3196_v37 }
 0xdad   :  { %2821 = vmatprep.subr.mxu1 %v3017_v0 }
 0xdae   :  { %2822 = vmatpush3.msra.mxu1 %v3209_v39 }
 0xdaf   :  { %2837 = vmatprep.subr.mxu1 %v3017_v0 }
 0xe59   :  { %v1522_v2 = vpop.f32.mrf.mxu0 }
 0xe5b   :  { %v2792_v5 = vpop.f32.mrf.mxu0 }
 0xe5f   :  { %v1447_v6 = vpop.f32.mrf.mxu1 }
 0xe60   :  { %v1448_v7 = vadd.f32 %v3262_v51, %v1447_v6 }
 0xe61   :  { %v2781_v10 = vpop.f32.mrf.mxu1 }
 0xe62   :  { %v1526_v11 = vadd.f32 %v1522_v2, %v1448_v7 }
 0xe64   :  { %2961 = vtanh.f32 %v1526_v11  ;;  %v1527_v17 = vmul.f32 0.5, %v1526_v11 }
 0xe67   :  { %v1617_v12 = vpop.f32.mrf.mxu1 }
 0xe68   :  { %v1621_v13 = vadd.f32 %v1617_v12, %v190_v8 }
 0xe69   :  { %v2803_v14 = vpop.f32.mrf.mxu1 }
 0xe6a   :  { %2963 = vtanh.f32 %v1621_v13  ;;  %v1622_v19 = vmul.f32 0.5, %v1621_v13 }
 0xe6b   :  { %2965 = vtanh.f32 %v1527_v17 }
 0xe6c   :  { %2967 = vtanh.f32 %v1622_v19 }
 0xe71   :  { %v2962_v15 = vpop.eup %2961 }
 0xe72   :  { %1534 = vrot.lane.b32.xlu1 %v2962_v15, %s3019_s24 }
 0xe77   :  { %v2964_v16 = vpop.eup %2963 }
 0xe78   :  { %1629 = vrot.lane.b32.xlu0 %v2964_v16, %s3019_s24  ;;  %v2966_v18 = vpop.eup %2965 }
 0xe79   :  { %v1529_v20 = vmul.f32 0.5, %v2966_v18  ;;  %v2968_v22 = vpop.eup %2967 }
 0xe7a   :  { %v1624_v45 = vmul.f32 0.5, %v2968_v22 }
 0xe7b   :  { %v1530_v21 = vadd.f32 0.5, %v1529_v20 }
 0xe7c   :  { %v1625_v25 = vadd.f32 0.5, %v1624_v45  ;;  %v3009_v45 = vld [vmem:[%s3665_s4 + $0x10] sm:$0xff] }
 0xe7d   :  { %v1532_v31 = vmul.f32 %v1530_v21, %v3427_v57 }
 0xe7e   :  { %v1627_v36 = vmul.f32 %v1625_v25, %v3431_v59 }
 0xee4   :  { %v1535_v23 = vpop.permute.xlu1 %1534 }
 0xee5   :  { %v1537_v9 = vmul.f32 %v1535_v23, %v1530_v21 }
 0xee7   :  { %1539 = vrot.lane.b32.xlu1 %v1537_v9, %s3019_s24  ;;  %v3008_v9 = vld [vmem:[%s3665_s4 + $0x18] sm:$0xff] }
 0xeea   :  { %v1630_v26 = vpop.permute.xlu0 %1629 }
 0xeeb   :  { %v1632_v27 = vmul.f32 %v1630_v26, %v1625_v25  ;;  %v3010_v26 = vld [vmem:[%s3665_s4 + $0x8] sm:$0xff] }
 0xeed   :  { %1634 = vrot.lane.b32.xlu0 %v1632_v27, %s3019_s24  ;;  %v3011_v27 = vld [vmem:[%s3665_s4] sm:$0xff] }
 0xf59   :  { %v1540_v24 = vpop.permute.xlu1 %1539 }
 0xf5a   :  { %v3479_v33 = vadd.f32 %v1540_v24, %v1532_v31  ;;  %v3012_v31 = vld [vmem:[%s3666_s5 + $0x18] sm:$0xff]  ;;  %v3013_v24 = vld [vmem:[%s3666_s5 + $0x10] sm:$0xff] }
 0xf5c   :  { %2969 = vtanh.f32 %v3479_v33 }
 0xf5f   :  { %v1635_v38 = vpop.permute.xlu0 %1634 }
 0xf60   :  { %v3483_v40 = vadd.f32 %v1635_v38, %v1627_v36  ;;  %v3015_v36 = vld [vmem:[%s3666_s5] sm:$0xff] }
 0xf62   :  { %2971 = vtanh.f32 %v3483_v40 }
 0xf69   :  { %v2970_v41 = vpop.eup %2969 }
 0xf6a   :  { %1545 = vrot.lane.b32.xlu1 %v2970_v41, %s3019_s24 }
 0xf6f   :  { %v2972_v42 = vpop.eup %2971 }
 0xf70   :  { %1640 = vrot.lane.b32.xlu0 %v2972_v42, %s3019_s24 }
 0xfdc   :  { %v1546_v49 = vpop.permute.xlu1 %1545 }
 0xfdd   :  { %v1548_v46 = vmul.f32 %v1546_v49, %v1530_v21 }
 0xfdf   :  { %1720 = vrot.lane.b32.xlu1 %v1548_v46, %s3020_s10 }
 0xfe2   :  { %v1641_v50 = vpop.permute.xlu0 %1640 }
 0xfe3   :  { %v1643_v52 = vmul.f32 %v1641_v50, %v1625_v25 }
 0xfe5   :  { %1645 = vrot.lane.b32.xlu0 %v1643_v52, %s3020_s10 }
0x1051   :  { %v1721_v53 = vpop.permute.xlu1 %1720 }
0x1052   :  { %2824 = vmatmul.mubr.msk.f32.vlgmr.msra.gmra.mxu1 %vm212_vm3, %v1721_v53 }
0x1053   :  { %2838 = vmatpush3.msra.mxu1 %v3143_v28  ;;  %2845 = vmatprep.mubr.msk.f32.mxu1 %vm3018_vm2, %v3017_v0  ;;  %v3503_v28 = vld [vmem:[%s3662_s2 + $0x18] sm:$0xff] }
0x1054   :  { %2839 = vmatprep.subr.mxu1 %v3017_v0 }
0x1055   :  { %2840 = vmatpush3.msra.mxu1 %v3148_v29  ;;  %v3513_v29 = vld [vmem:[%s3662_s2 + $0x10] sm:$0xff] }
0x1056   :  { %2841 = vmatprep.subr.mxu1 %v3017_v0 }
0x1057   :  { %v1646_v54 = vpop.permute.xlu0 %1645  ;;  %2842 = vmatpush3.msra.mxu1 %v3165_v32  ;;  %v3521_v32 = vld [vmem:[%s3662_s2 + $0x8] sm:$0xff] }
0x1058   :  { %2813 = vmatmul.mubr.msk.f32.vlgmr.msra.gmra.mxu0 %vm212_vm3, %v1646_v54  ;;  %2843 = vmatprep.subr.mxu1 %v3017_v0 }
0x1059   :  { %2827 = vmatpush3.msra.mxu0 %v3503_v28  ;;  %2834 = vmatprep.mubr.msk.f32.mxu0 %vm3018_vm2, %v3017_v0 }
0x105a   :  { %2828 = vmatprep.subr.mxu0 %v3017_v0  ;;  %2844 = vmatpush3.msra.mxu1 %v3182_v35  ;;  %v3528_v35 = vld [vmem:[%s3662_s2] sm:$0xff] }
0x105b   :  { %2829 = vmatpush3.msra.mxu0 %v3513_v29  ;;  %2859 = vmatprep.subr.mxu1 %v3017_v0 }
0x105c   :  { %2830 = vmatprep.subr.mxu0 %v3017_v0 }
0x105d   :  { %2831 = vmatpush3.msra.mxu0 %v3521_v32 }
0x105e   :  { %2832 = vmatprep.subr.mxu0 %v3017_v0 }
0x105f   :  { %2833 = vmatpush3.msra.mxu0 %v3528_v35 }
0x1060   :  { %2835 = vmatmul.mubr.msk.f32.vlgmr.msra.gmra.mxu0 %vm212_vm3, %v1646_v54  ;;  %2848 = vmatprep.subr.mxu0 %v3017_v0 }
0x1061   :  { %2849 = vmatpush3.msra.mxu0 %v3155_v30  ;;  %2856 = vmatprep.mubr.msk.f32.mxu0 %vm3018_vm2, %v3017_v0 }
0x1062   :  { %2850 = vmatprep.subr.mxu0 %v3017_v0 }
0x1063   :  { %2851 = vmatpush3.msra.mxu0 %v3177_v34  ;;  %v3547_v34 = vld [vmem:[%s3664_s3] ss:$0 sm:$0xff] }
0x1064   :  { %2852 = vmatprep.subr.mxu0 %v3017_v0  ;;  %v200_v50 = vadd.f32 %v3547_v34, %v3255_v47 }
0x1065   :  { %2853 = vmatpush3.msra.mxu0 %v3196_v37  ;;  %v195_v37 = vadd.f32 %v3547_v34, %v3257_v48 }
0x1066   :  { %2854 = vmatprep.subr.mxu0 %v3017_v0 }
0x1067   :  { %2855 = vmatpush3.msra.mxu0 %v3209_v39 }
0x1068   :  { %2870 = vmatprep.subr.mxu0 %v3017_v0 }
0x1112   :  { %v1790_v55 = vpop.f32.mrf.mxu1 }
0x1114   :  { %v2825_v56 = vpop.f32.mrf.mxu1 }
0x1118   :  { %v1715_v30 = vpop.f32.mrf.mxu0 }
0x1119   :  { %v1716_v57 = vadd.f32 %v3262_v51, %v1715_v30 }
0x111a   :  { %v2814_v43 = vpop.f32.mrf.mxu0 }
0x111b   :  { %v1794_v58 = vadd.f32 %v1790_v55, %v1716_v57 }
0x111d   :  { %2973 = vtanh.f32 %v1794_v58  ;;  %v1795_v63 = vmul.f32 0.5, %v1794_v58 }
0x1120   :  { %v1885_v59 = vpop.f32.mrf.mxu0 }
0x1121   :  { %v1889_v39 = vadd.f32 %v1885_v59, %v195_v37 }
0x1122   :  { %v2836_v60 = vpop.f32.mrf.mxu0 }
0x1123   :  { %2975 = vtanh.f32 %v1889_v39  ;;  %v1890_v44 = vmul.f32 0.5, %v1889_v39 }
0x1124   :  { %2977 = vtanh.f32 %v1795_v63 }
0x1125   :  { %2979 = vtanh.f32 %v1890_v44 }
0x112a   :  { %v2974_v61 = vpop.eup %2973 }
0x112b   :  { %1802 = vrot.lane.b32.xlu1 %v2974_v61, %s3019_s24 }
0x1130   :  { %v2976_v62 = vpop.eup %2975 }
0x1131   :  { %1897 = vrot.lane.b32.xlu0 %v2976_v62, %s3019_s24  ;;  %v2978_v1 = vpop.eup %2977 }
0x1132   :  { %v1797_v3 = vmul.f32 0.5, %v2978_v1  ;;  %v2980_v4 = vpop.eup %2979 }
0x1133   :  { %v1892_v6 = vmul.f32 0.5, %v2980_v4 }
0x1134   :  { %v1798_v2 = vadd.f32 0.5, %v1797_v3 }
0x1135   :  { %v1893_v7 = vadd.f32 0.5, %v1892_v6 }
0x1136   :  { %v1800_v8 = vmul.f32 %v1798_v2, %v3479_v33  ;;  %v3014_v33 = vld [vmem:[%s3666_s5 + $0x8] sm:$0xff] }
0x1137   :  { %v1895_v14 = vmul.f32 %v1893_v7, %v3483_v40 }
0x119d   :  { %v1803_v5 = vpop.permute.xlu1 %1802 }
0x119e   :  { %v1805_v48 = vmul.f32 %v1803_v5, %v1798_v2 }
0x11a0   :  { %1807 = vrot.lane.b32.xlu1 %v1805_v48, %s3019_s24 }
0x11a3   :  { %v1898_v10 = vpop.permute.xlu0 %1897 }
0x11a4   :  { %v1900_v11 = vmul.f32 %v1898_v10, %v1893_v7 }
0x11a6   :  { %1902 = vrot.lane.b32.xlu0 %v1900_v11, %s3019_s24 }
0x1212   :  { %v1808_v12 = vpop.permute.xlu1 %1807 }
0x1213   :  { %v3556_v13 = vadd.f32 %v1808_v12, %v1800_v8  ;;  %v3016_v8 = vld [vmem:[%s3667_s6] ss:$0 sm:$0xff] }
0x1215   :  { %2981 = vtanh.f32 %v3556_v13 }
0x1218   :  { %v1903_v15 = vpop.permute.xlu0 %1902 }
0x1219   :  { %v3560_v16 = vadd.f32 %v1903_v15, %v1895_v14 }
0x121b   :  { %2983 = vtanh.f32 %v3560_v16 }
0x1222   :  { %v2982_v17 = vpop.eup %2981 }
0x1223   :  { %1813 = vrot.lane.b32.xlu1 %v2982_v17, %s3019_s24 }
0x1228   :  { %v2984_v19 = vpop.eup %2983 }
0x1229   :  { %1908 = vrot.lane.b32.xlu0 %v2984_v19, %s3019_s24 }
0x1295   :  { %v1814_v18 = vpop.permute.xlu1 %1813 }
0x1296   :  { %v1816_v20 = vmul.f32 %v1814_v18, %v1798_v2 }
0x1298   :  { %1988 = vrot.lane.b32.xlu1 %v1816_v20, %s3020_s10 }
0x129b   :  { %v1909_v22 = vpop.permute.xlu0 %1908 }
0x129c   :  { %v1911_v21 = vmul.f32 %v1909_v22, %v1893_v7 }
0x129e   :  { %1913 = vrot.lane.b32.xlu0 %v1911_v21, %s3020_s10 }
0x130a   :  { %v1989_v23 = vpop.permute.xlu1 %1988 }
0x130b   :  { %2857 = vmatmul.mubr.msk.f32.vlgmr.msra.gmra.mxu0 %vm212_vm3, %v1989_v23 }
0x130c   :  { %2871 = vmatpush3.msra.mxu0 %v3008_v9  ;;  %2878 = vmatprep.mubr.msk.f32.mxu0 %vm3018_vm2, %v3017_v0 }
0x130d   :  { %2872 = vmatprep.subr.mxu0 %v3017_v0 }
0x130e   :  { %2873 = vmatpush3.msra.mxu0 %v3009_v45  ;;  %v2356_v45 = vld [vmem:[%s3668_s7 + $0x18] sm:$0xff] }
0x130f   :  { %2874 = vmatprep.subr.mxu0 %v3017_v0 }
0x1310   :  { %v1914_v25 = vpop.permute.xlu0 %1913  ;;  %2875 = vmatpush3.msra.mxu0 %v3010_v26  ;;  %v2354_v26 = vld [vmem:[%s3668_s7 + $0x8] sm:$0xff] }
0x1311   :  { %2846 = vmatmul.mubr.msk.f32.vlgmr.msra.gmra.mxu1 %vm212_vm3, %v1914_v25  ;;  %2876 = vmatprep.subr.mxu0 %v3017_v0 }
0x1312   :  { %2860 = vmatpush3.msra.mxu1 %v3503_v28  ;;  %2867 = vmatprep.mubr.msk.f32.mxu1 %vm3018_vm2, %v3017_v0 }
0x1313   :  { %2861 = vmatprep.subr.mxu1 %v3017_v0  ;;  %2877 = vmatpush3.msra.mxu0 %v3011_v27  ;;  %v2353_v27 = vld [vmem:[%s3668_s7] sm:$0xff] }
0x1314   :  { %2862 = vmatpush3.msra.mxu1 %v3513_v29  ;;  %2892 = vmatprep.subr.mxu0 %v3017_v0 }
0x1315   :  { %2863 = vmatprep.subr.mxu1 %v3017_v0 }
0x1316   :  { %2864 = vmatpush3.msra.mxu1 %v3521_v32 }
0x1317   :  { %2865 = vmatprep.subr.mxu1 %v3017_v0 }
0x1318   :  { %2866 = vmatpush3.msra.mxu1 %v3528_v35 }
0x1319   :  { %2868 = vmatmul.mubr.msk.f32.vlgmr.msra.gmra.mxu1 %vm212_vm3, %v1914_v25  ;;  %2881 = vmatprep.subr.mxu1 %v3017_v0  ;;  %v2355_v25 = vld [vmem:[%s3668_s7 + $0x10] sm:$0xff] }
0x131a   :  { %2882 = vmatpush3.msra.mxu1 %v3012_v31  ;;  %2889 = vmatprep.mubr.msk.f32.mxu1 %vm3018_vm2, %v3017_v0 }
0x131b   :  { %2883 = vmatprep.subr.mxu1 %v3017_v0 }
0x131c   :  { %2884 = vmatpush3.msra.mxu1 %v3013_v24  ;;  %v14_v24 = vstv %s3669_s8 }
0x131d   :  { %2885 = vmatprep.subr.mxu1 %v3017_v0  ;;  %15 = vst [vmem:[#allocation3] sm:$0x1] %v14_v24 }
0x131e   :  { %2886 = vmatpush3.msra.mxu1 %v3014_v33 }
0x131f   :  { %2887 = vmatprep.subr.mxu1 %v3017_v0 }
0x1320   :  { %2888 = vmatpush3.msra.mxu1 %v3015_v36 }
0x13cb   :  { %v2058_v38 = vpop.f32.mrf.mxu0 }
0x13cd   :  { %v2858_v40 = vpop.f32.mrf.mxu0 }
0x13ce   :  { %v2478_v40 = vld [vmem:[#allocation3] ss:$0 sm:$0xff] }
0x13d1   :  { %v1983_v41 = vpop.f32.mrf.mxu1 }
0x13d2   :  { %v1984_v42 = vadd.f32 %v3262_v51, %v1983_v41 }
0x13d3   :  { %v2847_v49 = vpop.f32.mrf.mxu1 }
0x13d4   :  { %v2062_v46 = vadd.f32 %v2058_v38, %v1984_v42 }
0x13d6   :  { %2985 = vtanh.f32 %v2062_v46  ;;  %v2063_v32 = vmul.f32 0.5, %v2062_v46 }
0x13d9   :  { %v2153_v52 = vpop.f32.mrf.mxu1 }
0x13da   :  { %v2157_v53 = vadd.f32 %v2153_v52, %v200_v50 }
0x13db   :  { %v2869_v54 = vpop.f32.mrf.mxu1 }
0x13dc   :  { %2987 = vtanh.f32 %v2157_v53  ;;  %v2158_v35 = vmul.f32 0.5, %v2157_v53 }
0x13dd   :  { %2989 = vtanh.f32 %v2063_v32 }
0x13de   :  { %2991 = vtanh.f32 %v2158_v35 }
0x13e3   :  { %v2986_v28 = vpop.eup %2985 }
0x13e4   :  { %2070 = vrot.lane.b32.xlu1 %v2986_v28, %s3019_s24 }
0x13e9   :  { %v2988_v29 = vpop.eup %2987 }
0x13ea   :  { %2165 = vrot.lane.b32.xlu0 %v2988_v29, %s3019_s24  ;;  %v2990_v51 = vpop.eup %2989 }
0x13eb   :  { %v2065_v55 = vmul.f32 0.5, %v2990_v51  ;;  %v2992_v56 = vpop.eup %2991 }
0x13ec   :  { %v2160_v43 = vmul.f32 0.5, %v2992_v56 }
0x13ed   :  { %v2066_v30 = vadd.f32 0.5, %v2065_v55 }
0x13ee   :  { %v2161_v58 = vadd.f32 0.5, %v2160_v43 }
0x13ef   :  { %v2068_v59 = vmul.f32 %v2066_v30, %v3556_v13 }
0x13f0   :  { %v2163_v61 = vmul.f32 %v2161_v58, %v3560_v16 }
0x1456   :  { %v2071_v57 = vpop.permute.xlu1 %2070 }
0x1457   :  { %v2073_v47 = vmul.f32 %v2071_v57, %v2066_v30 }
0x1459   :  { %2075 = vrot.lane.b32.xlu1 %v2073_v47, %s3019_s24 }
0x145c   :  { %v2166_v34 = vpop.permute.xlu0 %2165 }
0x145d   :  { %v2168_v37 = vmul.f32 %v2166_v34, %v2161_v58 }
0x145f   :  { %2170 = vrot.lane.b32.xlu0 %v2168_v37, %s3019_s24 }
0x14cb   :  { %v2076_v39 = vpop.permute.xlu1 %2075 }
0x14cc   :  { %v2078_v60 = vadd.f32 %v2076_v39, %v2068_v59 }
0x14ce   :  { %2993 = vtanh.f32 %v2078_v60 }
0x14d1   :  { %v2171_v62 = vpop.permute.xlu0 %2170 }
0x14d2   :  { %v2173_v63 = vadd.f32 %v2171_v62, %v2163_v61 }
0x14d4   :  { %2995 = vtanh.f32 %v2173_v63 }
0x14db   :  { %v2994_v44 = vpop.eup %2993 }
0x14dc   :  { %2081 = vrot.lane.b32.xlu1 %v2994_v44, %s3019_s24 }
0x14e1   :  { %v2996_v1 = vpop.eup %2995 }
0x14e2   :  { %2176 = vrot.lane.b32.xlu0 %v2996_v1, %s3019_s24 }
0x154e   :  { %v2082_v3 = vpop.permute.xlu1 %2081 }
0x154f   :  { %v2084_v4 = vmul.f32 %v2082_v3, %v2066_v30 }
0x1551   :  { %2256 = vrot.lane.b32.xlu1 %v2084_v4, %s3020_s10 }
0x1554   :  { %v2177_v2 = vpop.permute.xlu0 %2176 }
0x1555   :  { %v2179_v5 = vmul.f32 %v2177_v2, %v2161_v58 }
0x1557   :  { %2181 = vrot.lane.b32.xlu0 %v2179_v5, %s3020_s10 }
0x15c3   :  { %v2257_v48 = vpop.permute.xlu1 %2256 }
0x15c4   :  { %2890 = vmatmul.mubr.msk.f32.vlgmr.msra.gmra.mxu1 %vm212_vm3, %v2257_v48 }
0x15c9   :  { %v2182_v6 = vpop.permute.xlu0 %2181 }
0x15ca   :  { %2879 = vmatmul.mubr.msk.f32.vlgmr.msra.gmra.mxu0 %vm212_vm3, %v2182_v6 }
0x15cb   :  { %2900 = vmatprep.mubr.msk.f32.mxu0 %vm3018_vm2, %v3017_v0  ;;  %2893 = vmatpush3.msra.mxu0 %v2356_v45 }
0x15cc   :  { %2894 = vmatprep.subr.mxu0 %v3017_v0 }
0x15cd   :  { %2895 = vmatpush3.msra.mxu0 %v2355_v25 }
0x15ce   :  { %2896 = vmatprep.subr.mxu0 %v3017_v0 }
0x15cf   :  { %2897 = vmatpush3.msra.mxu0 %v2354_v26 }
0x15d0   :  { %2898 = vmatprep.subr.mxu0 %v3017_v0 }
0x15d1   :  { %2899 = vmatpush3.msra.mxu0 %v2353_v27 }
0x1684   :  { %v2326_v7 = vpop.f32.mrf.mxu1 }
0x1686   :  { %v2891_v10 = vpop.f32.mrf.mxu1 }
0x168a   :  { %v2251_v11 = vpop.f32.mrf.mxu0 }
0x168b   :  { %v2252_v12 = vadd.f32 %v3016_v8, %v2251_v11 }
0x168c   :  { %v2880_v13 = vpop.f32.mrf.mxu0 }
0x168d   :  { %v2330_v14 = vadd.f32 %v2326_v7, %v2252_v12 }
0x168f   :  { %2997 = vtanh.f32 %v2330_v14  ;;  %v2331_v16 = vmul.f32 0.5, %v2330_v14 }
0x1691   :  { %2999 = vtanh.f32 %v2331_v16 }
0x169c   :  { %v2998_v15 = vpop.eup %2997 }
0x169d   :  { %2338 = vrot.lane.b32.xlu0 %v2998_v15, %s3019_s24 }
0x169e   :  { %v3000_v17 = vpop.eup %2999 }
0x169f   :  { %v2333_v19 = vmul.f32 0.5, %v3000_v17 }
0x16a1   :  { %v2334_v18 = vadd.f32 0.5, %v2333_v19 }
0x16a3   :  { %v2336_v21 = vmul.f32 %v2334_v18, %v2078_v60 }
0x170f   :  { %v2339_v20 = vpop.permute.xlu0 %2338 }
0x1710   :  { %v2341_v22 = vmul.f32 %v2339_v20, %v2334_v18 }
0x1712   :  { %2343 = vrot.lane.b32.xlu1 %v2341_v22, %s3019_s24 }
0x1784   :  { %v2344_v23 = vpop.permute.xlu1 %2343 }
0x1785   :  { %v2346_v9 = vadd.f32 %v2344_v23, %v2336_v21 }
0x1787   :  { %3001 = vtanh.f32 %v2346_v9 }
0x1794   :  { %v3002_v31 = vpop.eup %3001 }
0x1795   :  { %2349 = vrot.lane.b32.xlu0 %v3002_v31, %s3019_s24 }
0x1807   :  { %v2350_v33 = vpop.permute.xlu0 %2349 }
0x1808   :  { %v2352_v36 = vmul.f32 %v2350_v33, %v2334_v18 }
0x180a   :  { %2365 = vrot.lane.b32.xlu1 %v2352_v36, %s3020_s10 }
0x187c   :  { %v2366_v38 = vpop.permute.xlu1 %2365 }
0x187d   :  { %2901 = vmatmul.mubr.msk.f32.vlgmr.msra.gmra.mxu0 %vm212_vm3, %v2366_v38 }
0x193d   :  { %v2435_v41 = vpop.f32.mrf.mxu0 }
0x193e   :  { %v2436_v0 = vadd.f32 %v2478_v40, %v2435_v41 }
0x193f   :  { %v2902_v42 = vpop.f32.mrf.mxu0 }
0x1940   :  { %2440 = vst.msk [vmem:[%s3670_s9] sm:$0xff] %vm2439_vm4, %v2436_v0 }

</bundles_post_ra>
